<compile_context>
chip_gen: v6e
topology: v6e:2x2x1
jax: 0.10.0
libtpu: 0.0.40
codegen_flags: <defaults>
</compile_context>

<pallas_src>
import jax
import jax.numpy as jnp
import numpy as np
from jax.experimental import pallas as pl
from jax.experimental.pallas import tpu as pltpu

BN_EPS = 1e-5
HIGH = jax.lax.Precision.HIGHEST
LAT_PAD = 128   # latent (1, 50) is stored lane-dense as (1, 128)


# =============================================================== in-kernel helpers
def _tap_mm(wk, xs):
    """One conv tap: wk (Cout, Cin) applied to xs (Cin, L)."""
    if wk.shape[1] == 1:
        # Degenerate contraction (Cin == 1): broadcast multiply on the VPU.
        return wk * xs
    return jnp.dot(wk, xs, preferred_element_type=jnp.float32)


def _conv_k3(x, w_ref, b, relu):
    """Conv1d(k=3, s=1, p=1) on a single sample.

    x: (Cin, L) f32 activations.
    w_ref: Ref of shape (3, Cout, Cin), tap-major (BN already folded in).
    b: (Cout, 1) bias.
    The +-1 taps are zero-padded shifts of the per-sample row; no boundary masks
    are needed because each grid program owns exactly one sample.
    """
    cin, L = x.shape
    zc = jnp.zeros((cin, 1), jnp.float32)
    x_m1 = jnp.concatenate([zc, x[:, :L - 1]], axis=1)   # x[:, t-1], zero at t=0
    x_p1 = jnp.concatenate([x[:, 1:], zc], axis=1)       # x[:, t+1], zero at t=L-1
    y = (_tap_mm(w_ref[0], x_m1)
         + _tap_mm(w_ref[1], x)
         + _tap_mm(w_ref[2], x_p1)
         + b)
    if relu:
        y = jnp.maximum(y, 0.0)
    return y


def _decode(z, d1w, d1b, d2w, d2b, d3w, d3b, u50, u100):
    """[ConvT+BN+ReLU+Up] x2 + ConvT on one sample.  z: (1, 50) -> (1, 200)."""
    h = _conv_k3(z, d1w, d1b[...], True)                                   # (32, 50)
    h = jnp.dot(h, u50[...], preferred_element_type=jnp.float32)           # (32, 100)
    h = _conv_k3(h, d2w, d2b[...], True)                                   # (8, 100)
    h = jnp.dot(h, u100[...], preferred_element_type=jnp.float32)          # (8, 200)
    h = _conv_k3(h, d3w, d3b[...], False)                                  # (1, 200)
    return h


# =============================================================== fused kernels
def _ae_kernel(x_ref,
               e1w, e1b, e2w, e2b, e3w, e3b,
               p200, p100,
               elw, elb, edw, edb,
               d1w, d1b, d2w, d2b, d3w, d3b,
               u50, u100,
               rec_ref, lat_ref):
    x = x_ref[0]                                                           # (1, 200)
    h = _conv_k3(x, e1w, e1b[...], True)                                   # (8, 200)
    h = jnp.dot(h, p200[...], preferred_element_type=jnp.float32)          # (8, 100)
    h = _conv_k3(h, e2w, e2b[...], True)                                   # (32, 100)
    h = jnp.dot(h, p100[...], preferred_element_type=jnp.float32)          # (32, 50)
    h = _conv_k3(h, e3w, e3b[...], False)                                  # (1, 50)

    # latent = encLin(h); stored lane-dense (padded to 128 lanes)
    y = jnp.dot(h, elw[...], preferred_element_type=jnp.float32) + elb[...]  # (1, 50)
    lat_ref[0] = jnp.concatenate(
        [y, jnp.zeros((1, LAT_PAD - 50), jnp.float32)], axis=1)

    # reconstruction path uses the pre-folded encLin∘decLin matrix
    z = jnp.dot(h, edw[...], preferred_element_type=jnp.float32) + edb[...]  # (1, 50)
    rec_ref[0] = _decode(z, d1w, d1b, d2w, d2b, d3w, d3b, u50, u100)          # (1, 200)


def _dec_kernel(z_ref, dlw, dlb, d1w, d1b, d2w, d2b, d3w, d3b, u50, u100, out_ref):
    zin = z_ref[0]                                                         # (1, 50)
    z = jnp.dot(zin, dlw[...], preferred_element_type=jnp.float32) + dlb[...]
    out_ref[0] = _decode(z, d1w, d1b, d2w, d2b, d3w, d3b, u50, u100)


# =============================================================== parameter prep
def _make_pool_matrix(L):
    # AvgPool1d(kernel=3, stride=2, padding=1, count_include_pad=True) as (L, Lout) matmul
    Lout = (L + 2 - 3) // 2 + 1
    P = np.zeros((L, Lout), np.float32)
    for t in range(Lout):
        for s in (2 * t - 1, 2 * t, 2 * t + 1):
            if 0 <= s < L:
                P[s, t] = 1.0 / 3.0
    return jnp.asarray(P)


def _make_upsample_matrix(L):
    # nn.Upsample(scale_factor=2, mode='nearest') as (L, 2L) matmul
    U = np.zeros((L, 2 * L), np.float32)
    for s in range(L):
        U[s, 2 * s] = 1.0
        U[s, 2 * s + 1] = 1.0
    return jnp.asarray(U)


def _prep_conv(w, b, bn=None):
    """w: (Cout, Cin, 3) PyTorch Conv1d layout -> (3, Cout, Cin) tap-major, BN folded."""
    wk = jnp.transpose(w, (2, 0, 1))                      # (3, Cout, Cin)
    bb = b
    if bn is not None:
        gamma, beta, mean, var = bn
        scale = gamma * jax.lax.rsqrt(var + BN_EPS)
        wk = wk * scale[None, :, None]
        bb = (b - mean) * scale + beta
    return wk, bb.reshape(-1, 1)


def _prep_convT(wT, b, bn=None):
    """wT: (Cin, Cout, 3) PyTorch ConvTranspose1d; s=1, p=1 transposed conv equals a
    regular conv with w_conv[o,i,k] = wT[i,o,2-k]."""
    w = jnp.transpose(jnp.flip(wT, axis=2), (1, 0, 2))
    return _prep_conv(w, b, bn)


def init_raw_params(key):
    ks = jax.random.split(key, 20)

    def conv_w(k, co, ci):
        return 0.3 * jax.random.normal(k, (co, ci, 3), jnp.float32)

    def convT_w(k, ci, co):
        return 0.3 * jax.random.normal(k, (ci, co, 3), jnp.float32)

    def bias(k, c):
        return 0.1 * jax.random.normal(k, (c,), jnp.float32)

    def bn_params(k, c):
        k1, k2, k3, k4 = jax.random.split(k, 4)
        gamma = 1.0 + 0.1 * jax.random.normal(k1, (c,), jnp.float32)
        beta = 0.1 * jax.random.normal(k2, (c,), jnp.float32)
        mean = 0.1 * jax.random.normal(k3, (c,), jnp.float32)
        var = jax.random.uniform(k4, (c,), jnp.float32, minval=0.5, maxval=1.5)
        return (gamma, beta, mean, var)

    def lin_params(k, fi, fo):
        k1, k2 = jax.random.split(k)
        return (0.2 * jax.random.normal(k1, (fo, fi), jnp.float32),
                0.1 * jax.random.normal(k2, (fo,), jnp.float32))

    raw = {}
    raw["e1_w"], raw["e1_b"], raw["e1_bn"] = conv_w(ks[0], 8, 1), bias(ks[1], 8), bn_params(ks[2], 8)
    raw["e2_w"], raw["e2_b"], raw["e2_bn"] = conv_w(ks[3], 32, 8), bias(ks[4], 32), bn_params(ks[5], 32)
    raw["e3_w"], raw["e3_b"] = conv_w(ks[6], 1, 32), bias(ks[7], 1)
    raw["encLin_w"], raw["encLin_b"] = lin_params(ks[8], 50, 50)
    raw["decLin_w"], raw["decLin_b"] = lin_params(ks[9], 50, 50)
    raw["d1_w"], raw["d1_b"], raw["d1_bn"] = convT_w(ks[10], 1, 32), bias(ks[11], 32), bn_params(ks[12], 32)
    raw["d2_w"], raw["d2_b"], raw["d2_bn"] = convT_w(ks[13], 32, 8), bias(ks[14], 8), bn_params(ks[15], 8)
    raw["d3_w"], raw["d3_b"] = convT_w(ks[16], 8, 1), bias(ks[17], 1)
    return raw


def prepare_params(raw):
    """Done once, outside jit: BN folding, ConvT rewrite, pool/upsample matrices,
    encLin∘decLin fold.  Nothing here depends on the batch size."""
    p = {}
    p["e1_w"], p["e1_b"] = _prep_conv(raw["e1_w"], raw["e1_b"], raw["e1_bn"])
    p["e2_w"], p["e2_b"] = _prep_conv(raw["e2_w"], raw["e2_b"], raw["e2_bn"])
    p["e3_w"], p["e3_b"] = _prep_conv(raw["e3_w"], raw["e3_b"])
    p["d1_w"], p["d1_b"] = _prep_convT(raw["d1_w"], raw["d1_b"], raw["d1_bn"])
    p["d2_w"], p["d2_b"] = _prep_convT(raw["d2_w"], raw["d2_b"], raw["d2_bn"])
    p["d3_w"], p["d3_b"] = _prep_convT(raw["d3_w"], raw["d3_b"])

    We_t = raw["encLin_w"].T                      # y = h @ We_t + be
    Wd_t = raw["decLin_w"].T                      # z = y @ Wd_t + bd
    p["encLin_wt"] = We_t
    p["encLin_b"] = raw["encLin_b"].reshape(1, 50)
    p["decLin_wt"] = Wd_t
    p["decLin_b"] = raw["decLin_b"].reshape(1, 50)
    # encLin∘decLin folded for the reconstruction path:  z = h @ (We_t Wd_t) + (be Wd_t + bd)
    p["encdec_wt"] = jnp.matmul(We_t, Wd_t, precision=HIGH)
    p["encdec_b"] = (jnp.matmul(raw["encLin_b"][None, :], Wd_t, precision=HIGH)
                     + raw["decLin_b"][None, :])

    p["P200"] = _make_pool_matrix(200)    # 200 -> 100
    p["P100"] = _make_pool_matrix(100)    # 100 -> 50
    p["U50"] = _make_upsample_matrix(50)      # 50 -> 100
    p["U100"] = _make_upsample_matrix(100)    # 100 -> 200
    return p


# =============================================================== forward (Pallas)
_COMPILER = pltpu.CompilerParams(dimension_semantics=("parallel",))


def _const_spec(shape):
    """Full-array block, constant index -> fetched once, stays resident in VMEM."""
    zeros = (0,) * len(shape)
    return pl.BlockSpec(shape, lambda n, _z=zeros: _z)


def _decoder_only_call(params, z, n):
    """z: (n, 50) latent -> (n, 200) reconstruction, one grid program per sample."""
    w_args = (params["decLin_wt"], params["decLin_b"],
              params["d1_w"], params["d1_b"], params["d2_w"], params["d2_b"],
              params["d3_w"], params["d3_b"], params["U50"], params["U100"])
    in_specs = [pl.BlockSpec((1, 1, 50), lambda i: (i, 0, 0))] + \
               [_const_spec(a.shape) for a in w_args]
    out = pl.pallas_call(
        _dec_kernel,
        grid=(n,),
        in_specs=in_specs,
        out_specs=pl.BlockSpec((1, 1, 200), lambda i: (i, 0, 0)),
        out_shape=jax.ShapeDtypeStruct((n, 1, 200), jnp.float32),
        compiler_params=_COMPILER,
    )(z.reshape(n, 1, 50), *w_args)
    return out.reshape(n, 200)


def autoencoder_forward(params, x):
    """Mirror of AutoEncoder.forward (AE_Model == 5, n_chLatent == 1)."""
    if x.shape[-1] != 200:
        # decoder-only branch: x is (1, n, 50)
        x0 = x[0]
        n = x0.shape[0]
        return _decoder_only_call(params, x0, n)[None]           # (1, n, 200)

    N = x.shape[0]
    w_args = (params["e1_w"], params["e1_b"], params["e2_w"], params["e2_b"],
              params["e3_w"], params["e3_b"],
              params["P200"], params["P100"],
              params["encLin_wt"], params["encLin_b"],
              params["encdec_wt"], params["encdec_b"],
              params["d1_w"], params["d1_b"], params["d2_w"], params["d2_b"],
              params["d3_w"], params["d3_b"],
              params["U50"], params["U100"])
    in_specs = [pl.BlockSpec((1, 1, 200), lambda i: (i, 0, 0))] + \
               [_const_spec(a.shape) for a in w_args]
    rec3, lat3 = pl.pallas_call(
        _ae_kernel,
        grid=(N,),
        in_specs=in_specs,
        out_specs=(pl.BlockSpec((1, 1, 200), lambda i: (i, 0, 0)),
                   pl.BlockSpec((1, 1, LAT_PAD), lambda i: (i, 0, 0))),
        out_shape=(jax.ShapeDtypeStruct((N, 1, 200), jnp.float32),
                   jax.ShapeDtypeStruct((N, 1, LAT_PAD), jnp.float32)),
        compiler_params=_COMPILER,
    )(x.reshape(N, 1, 200), *w_args)
    return rec3.reshape(N, 200), lat3.reshape(N, LAT_PAD)[:, :50]


# =============================================================== pure-JAX reference
def _ref_conv1d(x, w, b):          # x: (N,Cin,L); w: (Cout,Cin,3); b: (Cout,)
    xp = jnp.pad(x, ((0, 0), (0, 0), (1, 1)))
    y = (jnp.einsum('oi,nil->nol', w[:, :, 0], xp[:, :, :-2], precision=HIGH)
         + jnp.einsum('oi,nil->nol', w[:, :, 1], xp[:, :, 1:-1], precision=HIGH)
         + jnp.einsum('oi,nil->nol', w[:, :, 2], xp[:, :, 2:], precision=HIGH))
    return y + b[None, :, None]


def _ref_convT1d(x, wT, b):        # x: (N,Cin,L); wT: (Cin,Cout,3); b: (Cout,)
    xp = jnp.pad(x, ((0, 0), (0, 0), (1, 1)))
    y = (jnp.einsum('io,nil->nol', wT[:, :, 0], xp[:, :, 2:], precision=HIGH)
         + jnp.einsum('io,nil->nol', wT[:, :, 1], xp[:, :, 1:-1], precision=HIGH)
         + jnp.einsum('io,nil->nol', wT[:, :, 2], xp[:, :, :-2], precision=HIGH))
    return y + b[None, :, None]


def _ref_bn_relu(y, bn):
    g, be, mu, var = bn
    y = (y - mu[None, :, None]) * jax.lax.rsqrt(var[None, :, None] + BN_EPS) \
        * g[None, :, None] + be[None, :, None]
    return jnp.maximum(y, 0.0)


def _ref_avgpool(x):               # AvgPool1d(3, 2, 1)
    L = x.shape[-1]
    Lout = (L + 2 - 3) // 2 + 1
    xp = jnp.pad(x, ((0, 0), (0, 0), (1, 1)))
    return (xp[..., 0:2 * Lout:2] + xp[..., 1:2 * Lout:2] + xp[..., 2:2 * Lout + 1:2]) / 3.0


def reference_forward(raw, x):
    n = x.shape[0]
    h = x[:, None, :]
    h = _ref_avgpool(_ref_bn_relu(_ref_conv1d(h, raw["e1_w"], raw["e1_b"]), raw["e1_bn"]))
    h = _ref_avgpool(_ref_bn_relu(_ref_conv1d(h, raw["e2_w"], raw["e2_b"]), raw["e2_bn"]))
    h = _ref_conv1d(h, raw["e3_w"], raw["e3_b"])
    y = jnp.matmul(h.reshape(n, -1), raw["encLin_w"].T, precision=HIGH) + raw["encLin_b"]
    z = jnp.matmul(y, raw["decLin_w"].T, precision=HIGH) + raw["decLin_b"]
    h = z[:, None, :]
    h = jnp.repeat(_ref_bn_relu(_ref_convT1d(h, raw["d1_w"], raw["d1_b"]), raw["d1_bn"]), 2, axis=-1)
    h = jnp.repeat(_ref_bn_relu(_ref_convT1d(h, raw["d2_w"], raw["d2_b"]), raw["d2_bn"]), 2, axis=-1)
    h = _ref_convT1d(h, raw["d3_w"], raw["d3_b"])
    return h[:, 0], y


def reference_decoder(raw, x):
    x0 = x[0]
    z = jnp.matmul(x0, raw["decLin_w"].T, precision=HIGH) + raw["decLin_b"]
    h = z[:, None, :]
    h = jnp.repeat(_ref_bn_relu(_ref_convT1d(h, raw["d1_w"], raw["d1_b"]), raw["d1_bn"]), 2, axis=-1)
    h = jnp.repeat(_ref_bn_relu(_ref_convT1d(h, raw["d2_w"], raw["d2_b"]), raw["d2_bn"]), 2, axis=-1)
    h = _ref_convT1d(h, raw["d3_w"], raw["d3_b"])
    return h[:, 0][None]


# =============================================================== main
if __name__ == "__main__":
    raw = init_raw_params(jax.random.PRNGKey(42))
    params = prepare_params(raw)
    x = jax.random.normal(jax.random.PRNGKey(0), (2, 200), dtype=jnp.float32)

    fwd = jax.jit(autoencoder_forward)

    # main branch: (reconstruction, latent)
    rec, lat = fwd(params, x)
    jax.block_until_ready((rec, lat))
    assert rec.shape == (2, 200), rec.shape
    assert lat.shape == (2, 50), lat.shape
    assert bool(jnp.all(jnp.isfinite(rec))) and bool(jnp.all(jnp.isfinite(lat)))

    # correctness vs. pure-JAX reference built from the raw (unfolded) parameters
    rec_ref, lat_ref = reference_forward(raw, x)

    def _relerr(a, b):
        return float(jnp.linalg.norm(a - b) / (jnp.linalg.norm(b) + 1e-12))

    assert _relerr(rec, rec_ref) < 2e-2, ("rec mismatch", _relerr(rec, rec_ref))
    assert _relerr(lat, lat_ref) < 2e-2, ("latent mismatch", _relerr(lat, lat_ref))

    # decoder-only branch: input (1, n, 50)
    z_in = jax.random.normal(jax.random.PRNGKey(1), (1, 2, 50), dtype=jnp.float32)
    dec_out = fwd(params, z_in)
    jax.block_until_ready(dec_out)
    assert dec_out.shape == (1, 2, 200), dec_out.shape
    assert bool(jnp.all(jnp.isfinite(dec_out)))
    dec_ref = reference_decoder(raw, z_in)
    assert _relerr(dec_out, dec_ref) < 2e-2, ("decoder mismatch", _relerr(dec_out, dec_ref))

    print("KERNEL_OK")
</pallas_src>

<mosaic_0001>
module attributes {stable_mosaic.version = 11 : i64} {
  func.func @_ae_kernel(%arg0: i32, %arg1: memref<1x1x200xf32, #tpu.memory_space<vmem>>, %arg2: memref<3x8x1xf32, #tpu.memory_space<vmem>>, %arg3: memref<8x1xf32, #tpu.memory_space<vmem>>, %arg4: memref<3x32x8xf32, #tpu.memory_space<vmem>>, %arg5: memref<32x1xf32, #tpu.memory_space<vmem>>, %arg6: memref<3x1x32xf32, #tpu.memory_space<vmem>>, %arg7: memref<1x1xf32, #tpu.memory_space<vmem>>, %arg8: memref<200x100xf32, #tpu.memory_space<vmem>>, %arg9: memref<100x50xf32, #tpu.memory_space<vmem>>, %arg10: memref<50x50xf32, #tpu.memory_space<vmem>>, %arg11: memref<1x50xf32, #tpu.memory_space<vmem>>, %arg12: memref<50x50xf32, #tpu.memory_space<vmem>>, %arg13: memref<1x50xf32, #tpu.memory_space<vmem>>, %arg14: memref<3x32x1xf32, #tpu.memory_space<vmem>>, %arg15: memref<32x1xf32, #tpu.memory_space<vmem>>, %arg16: memref<3x8x32xf32, #tpu.memory_space<vmem>>, %arg17: memref<8x1xf32, #tpu.memory_space<vmem>>, %arg18: memref<3x1x8xf32, #tpu.memory_space<vmem>>, %arg19: memref<1x1xf32, #tpu.memory_space<vmem>>, %arg20: memref<50x100xf32, #tpu.memory_space<vmem>>, %arg21: memref<100x200xf32, #tpu.memory_space<vmem>>, %arg22: memref<1x1x200xf32, #tpu.memory_space<vmem>>, %arg23: memref<1x1x128xf32, #tpu.memory_space<vmem>>) attributes {dimension_semantics = [#tpu.dimension_semantics<parallel>], iteration_bounds = array<i64: 2>, scalar_prefetch = 0 : i64, scratch_operands = 0 : i64, tpu.core_type = #tpu.core_type<tc>, window_params = [{transform_indices = @transform_0, window_bounds = array<i64: 1, 1, 200>}, {pipeline_mode = #tpu.pipeline_mode<synchronous>, transform_indices = @transform_1, window_bounds = array<i64: 3, 8, 1>}, {pipeline_mode = #tpu.pipeline_mode<synchronous>, transform_indices = @transform_2, window_bounds = array<i64: 8, 1>}, {pipeline_mode = #tpu.pipeline_mode<synchronous>, transform_indices = @transform_3, window_bounds = array<i64: 3, 32, 8>}, {pipeline_mode = #tpu.pipeline_mode<synchronous>, transform_indices = @transform_4, window_bounds = array<i64: 32, 1>}, {pipeline_mode = #tpu.pipeline_mode<synchronous>, transform_indices = @transform_5, window_bounds = array<i64: 3, 1, 32>}, {pipeline_mode = #tpu.pipeline_mode<synchronous>, transform_indices = @transform_6, window_bounds = array<i64: 1, 1>}, {pipeline_mode = #tpu.pipeline_mode<synchronous>, transform_indices = @transform_7, window_bounds = array<i64: 200, 100>}, {pipeline_mode = #tpu.pipeline_mode<synchronous>, transform_indices = @transform_8, window_bounds = array<i64: 100, 50>}, {pipeline_mode = #tpu.pipeline_mode<synchronous>, transform_indices = @transform_9, window_bounds = array<i64: 50, 50>}, {pipeline_mode = #tpu.pipeline_mode<synchronous>, transform_indices = @transform_10, window_bounds = array<i64: 1, 50>}, {pipeline_mode = #tpu.pipeline_mode<synchronous>, transform_indices = @transform_11, window_bounds = array<i64: 50, 50>}, {pipeline_mode = #tpu.pipeline_mode<synchronous>, transform_indices = @transform_12, window_bounds = array<i64: 1, 50>}, {pipeline_mode = #tpu.pipeline_mode<synchronous>, transform_indices = @transform_13, window_bounds = array<i64: 3, 32, 1>}, {pipeline_mode = #tpu.pipeline_mode<synchronous>, transform_indices = @transform_14, window_bounds = array<i64: 32, 1>}, {pipeline_mode = #tpu.pipeline_mode<synchronous>, transform_indices = @transform_15, window_bounds = array<i64: 3, 8, 32>}, {pipeline_mode = #tpu.pipeline_mode<synchronous>, transform_indices = @transform_16, window_bounds = array<i64: 8, 1>}, {pipeline_mode = #tpu.pipeline_mode<synchronous>, transform_indices = @transform_17, window_bounds = array<i64: 3, 1, 8>}, {pipeline_mode = #tpu.pipeline_mode<synchronous>, transform_indices = @transform_18, window_bounds = array<i64: 1, 1>}, {pipeline_mode = #tpu.pipeline_mode<synchronous>, transform_indices = @transform_19, window_bounds = array<i64: 50, 100>}, {pipeline_mode = #tpu.pipeline_mode<synchronous>, transform_indices = @transform_20, window_bounds = array<i64: 100, 200>}, {transform_indices = @transform_21, window_bounds = array<i64: 1, 1, 200>}, {transform_indices = @transform_22, window_bounds = array<i64: 1, 1, 128>}]} {
    %c0 = arith.constant 0 : index
    %c0_0 = arith.constant 0 : index
    %c0_1 = arith.constant 0 : index
    %0 = vector.load %arg1[%c0, %c0_0, %c0_1] : memref<1x1x200xf32, #tpu.memory_space<vmem>>, vector<1x1x200xf32>
    %1 = vector.shape_cast %0 : vector<1x1x200xf32> to vector<1x200xf32>
    %c0_2 = arith.constant 0 : index
    %c0_3 = arith.constant 0 : index
    %2 = vector.load %arg3[%c0_2, %c0_3] : memref<8x1xf32, #tpu.memory_space<vmem>>, vector<8x1xf32>
    %cst = arith.constant 0.000000e+00 : f32
    %3 = vector.broadcast %cst : f32 to vector<1x1xf32>
    %4 = vector.extract_strided_slice %1 {offsets = [0, 0], sizes = [1, 199], strides = [1, 1]} : vector<1x200xf32> to vector<1x199xf32>
    %5 = tpu.concatenate %3, %4 in 1 : vector<1x1xf32>, vector<1x199xf32> -> vector<1x200xf32>
    %6 = vector.extract_strided_slice %1 {offsets = [0, 1], sizes = [1, 199], strides = [1, 1]} : vector<1x200xf32> to vector<1x199xf32>
    %7 = tpu.concatenate %6, %3 in 1 : vector<1x199xf32>, vector<1x1xf32> -> vector<1x200xf32>
    %c0_4 = arith.constant 0 : index
    %c0_5 = arith.constant 0 : index
    %c0_6 = arith.constant 0 : index
    %8 = vector.load %arg2[%c0_4, %c0_5, %c0_6] : memref<3x8x1xf32, #tpu.memory_space<vmem>>, vector<1x8x1xf32>
    %9 = vector.shape_cast %8 : vector<1x8x1xf32> to vector<8x1xf32>
    %10 = vector.broadcast %9 : vector<8x1xf32> to vector<8x200xf32>
    %11 = vector.broadcast %5 : vector<1x200xf32> to vector<8x200xf32>
    %12 = arith.mulf %10, %11 : vector<8x200xf32>
    %c1 = arith.constant 1 : index
    %c0_7 = arith.constant 0 : index
    %c0_8 = arith.constant 0 : index
    %13 = vector.load %arg2[%c1, %c0_7, %c0_8] : memref<3x8x1xf32, #tpu.memory_space<vmem>>, vector<1x8x1xf32>
    %14 = vector.shape_cast %13 : vector<1x8x1xf32> to vector<8x1xf32>
    %15 = vector.broadcast %14 : vector<8x1xf32> to vector<8x200xf32>
    %16 = vector.broadcast %1 : vector<1x200xf32> to vector<8x200xf32>
    %17 = arith.mulf %15, %16 : vector<8x200xf32>
    %18 = arith.addf %12, %17 : vector<8x200xf32>
    %c2 = arith.constant 2 : index
    %c0_9 = arith.constant 0 : index
    %c0_10 = arith.constant 0 : index
    %19 = vector.load %arg2[%c2, %c0_9, %c0_10] : memref<3x8x1xf32, #tpu.memory_space<vmem>>, vector<1x8x1xf32>
    %20 = vector.shape_cast %19 : vector<1x8x1xf32> to vector<8x1xf32>
    %21 = vector.broadcast %20 : vector<8x1xf32> to vector<8x200xf32>
    %22 = vector.broadcast %7 : vector<1x200xf32> to vector<8x200xf32>
    %23 = arith.mulf %21, %22 : vector<8x200xf32>
    %24 = arith.addf %18, %23 : vector<8x200xf32>
    %25 = vector.broadcast %2 : vector<8x1xf32> to vector<8x200xf32>
    %26 = arith.addf %24, %25 : vector<8x200xf32>
    %cst_11 = arith.constant 0.000000e+00 : f32
    %27 = vector.broadcast %cst_11 : f32 to vector<8x200xf32>
    %28 = arith.maximumf %26, %27 : vector<8x200xf32>
    %c0_12 = arith.constant 0 : index
    %c0_13 = arith.constant 0 : index
    %29 = vector.load %arg8[%c0_12, %c0_13] : memref<200x100xf32, #tpu.memory_space<vmem>>, vector<200x100xf32>
    %cst_14 = arith.constant dense<0.000000e+00> : vector<8x100xf32>
    %30 = tpu.matmul %28, %29, %cst_14 {dimension_numbers = #tpu.dot_dimension_numbers<[1], [0], [0], [1], [0, 0, 1, 1], [], []>} : vector<8x200xf32>, vector<200x100xf32>, vector<8x100xf32> -> vector<8x100xf32>
    %c0_15 = arith.constant 0 : index
    %c0_16 = arith.constant 0 : index
    %31 = vector.load %arg5[%c0_15, %c0_16] : memref<32x1xf32, #tpu.memory_space<vmem>>, vector<32x1xf32>
    %cst_17 = arith.constant 0.000000e+00 : f32
    %32 = vector.broadcast %cst_17 : f32 to vector<8x1xf32>
    %33 = vector.extract_strided_slice %30 {offsets = [0, 0], sizes = [8, 99], strides = [1, 1]} : vector<8x100xf32> to vector<8x99xf32>
    %34 = tpu.concatenate %32, %33 in 1 : vector<8x1xf32>, vector<8x99xf32> -> vector<8x100xf32>
    %35 = vector.extract_strided_slice %30 {offsets = [0, 1], sizes = [8, 99], strides = [1, 1]} : vector<8x100xf32> to vector<8x99xf32>
    %36 = tpu.concatenate %35, %32 in 1 : vector<8x99xf32>, vector<8x1xf32> -> vector<8x100xf32>
    %c0_18 = arith.constant 0 : index
    %c0_19 = arith.constant 0 : index
    %c0_20 = arith.constant 0 : index
    %37 = vector.load %arg4[%c0_18, %c0_19, %c0_20] : memref<3x32x8xf32, #tpu.memory_space<vmem>>, vector<1x32x8xf32>
    %38 = vector.shape_cast %37 : vector<1x32x8xf32> to vector<32x8xf32>
    %cst_21 = arith.constant dense<0.000000e+00> : vector<32x100xf32>
    %39 = tpu.matmul %38, %34, %cst_21 {dimension_numbers = #tpu.dot_dimension_numbers<[1], [0], [0], [1], [0, 0, 1, 1], [], []>} : vector<32x8xf32>, vector<8x100xf32>, vector<32x100xf32> -> vector<32x100xf32>
    %c1_22 = arith.constant 1 : index
    %c0_23 = arith.constant 0 : index
    %c0_24 = arith.constant 0 : index
    %40 = vector.load %arg4[%c1_22, %c0_23, %c0_24] : memref<3x32x8xf32, #tpu.memory_space<vmem>>, vector<1x32x8xf32>
    %41 = vector.shape_cast %40 : vector<1x32x8xf32> to vector<32x8xf32>
    %cst_25 = arith.constant dense<0.000000e+00> : vector<32x100xf32>
    %42 = tpu.matmul %41, %30, %cst_25 {dimension_numbers = #tpu.dot_dimension_numbers<[1], [0], [0], [1], [0, 0, 1, 1], [], []>} : vector<32x8xf32>, vector<8x100xf32>, vector<32x100xf32> -> vector<32x100xf32>
    %43 = arith.addf %39, %42 : vector<32x100xf32>
    %c2_26 = arith.constant 2 : index
    %c0_27 = arith.constant 0 : index
    %c0_28 = arith.constant 0 : index
    %44 = vector.load %arg4[%c2_26, %c0_27, %c0_28] : memref<3x32x8xf32, #tpu.memory_space<vmem>>, vector<1x32x8xf32>
    %45 = vector.shape_cast %44 : vector<1x32x8xf32> to vector<32x8xf32>
    %cst_29 = arith.constant dense<0.000000e+00> : vector<32x100xf32>
    %46 = tpu.matmul %45, %36, %cst_29 {dimension_numbers = #tpu.dot_dimension_numbers<[1], [0], [0], [1], [0, 0, 1, 1], [], []>} : vector<32x8xf32>, vector<8x100xf32>, vector<32x100xf32> -> vector<32x100xf32>
    %47 = arith.addf %43, %46 : vector<32x100xf32>
    %48 = vector.broadcast %31 : vector<32x1xf32> to vector<32x100xf32>
    %49 = arith.addf %47, %48 : vector<32x100xf32>
    %cst_30 = arith.constant 0.000000e+00 : f32
    %50 = vector.broadcast %cst_30 : f32 to vector<32x100xf32>
    %51 = arith.maximumf %49, %50 : vector<32x100xf32>
    %c0_31 = arith.constant 0 : index
    %c0_32 = arith.constant 0 : index
    %52 = vector.load %arg9[%c0_31, %c0_32] : memref<100x50xf32, #tpu.memory_space<vmem>>, vector<100x50xf32>
    %cst_33 = arith.constant dense<0.000000e+00> : vector<32x50xf32>
    %53 = tpu.matmul %51, %52, %cst_33 {dimension_numbers = #tpu.dot_dimension_numbers<[1], [0], [0], [1], [0, 0, 1, 1], [], []>} : vector<32x100xf32>, vector<100x50xf32>, vector<32x50xf32> -> vector<32x50xf32>
    %c0_34 = arith.constant 0 : index
    %c0_35 = arith.constant 0 : index
    %54 = vector.load %arg7[%c0_34, %c0_35] : memref<1x1xf32, #tpu.memory_space<vmem>>, vector<1x1xf32>
    %cst_36 = arith.constant 0.000000e+00 : f32
    %55 = vector.broadcast %cst_36 : f32 to vector<32x1xf32>
    %56 = vector.extract_strided_slice %53 {offsets = [0, 0], sizes = [32, 49], strides = [1, 1]} : vector<32x50xf32> to vector<32x49xf32>
    %57 = tpu.concatenate %55, %56 in 1 : vector<32x1xf32>, vector<32x49xf32> -> vector<32x50xf32>
    %58 = vector.extract_strided_slice %53 {offsets = [0, 1], sizes = [32, 49], strides = [1, 1]} : vector<32x50xf32> to vector<32x49xf32>
    %59 = tpu.concatenate %58, %55 in 1 : vector<32x49xf32>, vector<32x1xf32> -> vector<32x50xf32>
    %c0_37 = arith.constant 0 : index
    %c0_38 = arith.constant 0 : index
    %c0_39 = arith.constant 0 : index
    %60 = vector.load %arg6[%c0_37, %c0_38, %c0_39] : memref<3x1x32xf32, #tpu.memory_space<vmem>>, vector<1x1x32xf32>
    %61 = vector.shape_cast %60 : vector<1x1x32xf32> to vector<1x32xf32>
    %cst_40 = arith.constant dense<0.000000e+00> : vector<1x50xf32>
    %62 = tpu.matmul %61, %57, %cst_40 {dimension_numbers = #tpu.dot_dimension_numbers<[1], [0], [0], [1], [0, 0, 1, 1], [], []>} : vector<1x32xf32>, vector<32x50xf32>, vector<1x50xf32> -> vector<1x50xf32>
    %c1_41 = arith.constant 1 : index
    %c0_42 = arith.constant 0 : index
    %c0_43 = arith.constant 0 : index
    %63 = vector.load %arg6[%c1_41, %c0_42, %c0_43] : memref<3x1x32xf32, #tpu.memory_space<vmem>>, vector<1x1x32xf32>
    %64 = vector.shape_cast %63 : vector<1x1x32xf32> to vector<1x32xf32>
    %cst_44 = arith.constant dense<0.000000e+00> : vector<1x50xf32>
    %65 = tpu.matmul %64, %53, %cst_44 {dimension_numbers = #tpu.dot_dimension_numbers<[1], [0], [0], [1], [0, 0, 1, 1], [], []>} : vector<1x32xf32>, vector<32x50xf32>, vector<1x50xf32> -> vector<1x50xf32>
    %66 = arith.addf %62, %65 : vector<1x50xf32>
    %c2_45 = arith.constant 2 : index
    %c0_46 = arith.constant 0 : index
    %c0_47 = arith.constant 0 : index
    %67 = vector.load %arg6[%c2_45, %c0_46, %c0_47] : memref<3x1x32xf32, #tpu.memory_space<vmem>>, vector<1x1x32xf32>
    %68 = vector.shape_cast %67 : vector<1x1x32xf32> to vector<1x32xf32>
    %cst_48 = arith.constant dense<0.000000e+00> : vector<1x50xf32>
    %69 = tpu.matmul %68, %59, %cst_48 {dimension_numbers = #tpu.dot_dimension_numbers<[1], [0], [0], [1], [0, 0, 1, 1], [], []>} : vector<1x32xf32>, vector<32x50xf32>, vector<1x50xf32> -> vector<1x50xf32>
    %70 = arith.addf %66, %69 : vector<1x50xf32>
    %71 = vector.broadcast %54 : vector<1x1xf32> to vector<1x50xf32>
    %72 = arith.addf %70, %71 : vector<1x50xf32>
    %c0_49 = arith.constant 0 : index
    %c0_50 = arith.constant 0 : index
    %73 = vector.load %arg10[%c0_49, %c0_50] : memref<50x50xf32, #tpu.memory_space<vmem>>, vector<50x50xf32>
    %cst_51 = arith.constant dense<0.000000e+00> : vector<1x50xf32>
    %74 = tpu.matmul %72, %73, %cst_51 {dimension_numbers = #tpu.dot_dimension_numbers<[1], [0], [0], [1], [0, 0, 1, 1], [], []>} : vector<1x50xf32>, vector<50x50xf32>, vector<1x50xf32> -> vector<1x50xf32>
    %c0_52 = arith.constant 0 : index
    %c0_53 = arith.constant 0 : index
    %75 = vector.load %arg11[%c0_52, %c0_53] : memref<1x50xf32, #tpu.memory_space<vmem>>, vector<1x50xf32>
    %76 = arith.addf %74, %75 : vector<1x50xf32>
    %cst_54 = arith.constant 0.000000e+00 : f32
    %77 = vector.broadcast %cst_54 : f32 to vector<1x78xf32>
    %78 = tpu.concatenate %76, %77 in 1 : vector<1x50xf32>, vector<1x78xf32> -> vector<1x128xf32>
    %c0_55 = arith.constant 0 : index
    %c0_56 = arith.constant 0 : index
    %c0_57 = arith.constant 0 : index
    %79 = vector.load %arg23[%c0_55, %c0_56, %c0_57] : memref<1x1x128xf32, #tpu.memory_space<vmem>>, vector<1x1x128xf32>
    %80 = vector.shape_cast %79 : vector<1x1x128xf32> to vector<1x128xf32>
    %81 = vector.shape_cast %78 : vector<1x128xf32> to vector<1x1x128xf32>
    tpu.vector_store %arg23[%c0_55, %c0_56, %c0_57], %81 {strides = array<i32>} : memref<1x1x128xf32, #tpu.memory_space<vmem>>, vector<1x1x128xf32>,
    %c0_58 = arith.constant 0 : index
    %c0_59 = arith.constant 0 : index
    %82 = vector.load %arg12[%c0_58, %c0_59] : memref<50x50xf32, #tpu.memory_space<vmem>>, vector<50x50xf32>
    %cst_60 = arith.constant dense<0.000000e+00> : vector<1x50xf32>
    %83 = tpu.matmul %72, %82, %cst_60 {dimension_numbers = #tpu.dot_dimension_numbers<[1], [0], [0], [1], [0, 0, 1, 1], [], []>} : vector<1x50xf32>, vector<50x50xf32>, vector<1x50xf32> -> vector<1x50xf32>
    %c0_61 = arith.constant 0 : index
    %c0_62 = arith.constant 0 : index
    %84 = vector.load %arg13[%c0_61, %c0_62] : memref<1x50xf32, #tpu.memory_space<vmem>>, vector<1x50xf32>
    %85 = arith.addf %83, %84 : vector<1x50xf32>
    %c0_63 = arith.constant 0 : index
    %c0_64 = arith.constant 0 : index
    %86 = vector.load %arg15[%c0_63, %c0_64] : memref<32x1xf32, #tpu.memory_space<vmem>>, vector<32x1xf32>
    %cst_65 = arith.constant 0.000000e+00 : f32
    %87 = vector.broadcast %cst_65 : f32 to vector<1x1xf32>
    %88 = vector.extract_strided_slice %85 {offsets = [0, 0], sizes = [1, 49], strides = [1, 1]} : vector<1x50xf32> to vector<1x49xf32>
    %89 = tpu.concatenate %87, %88 in 1 : vector<1x1xf32>, vector<1x49xf32> -> vector<1x50xf32>
    %90 = vector.extract_strided_slice %85 {offsets = [0, 1], sizes = [1, 49], strides = [1, 1]} : vector<1x50xf32> to vector<1x49xf32>
    %91 = tpu.concatenate %90, %87 in 1 : vector<1x49xf32>, vector<1x1xf32> -> vector<1x50xf32>
    %c0_66 = arith.constant 0 : index
    %c0_67 = arith.constant 0 : index
    %c0_68 = arith.constant 0 : index
    %92 = vector.load %arg14[%c0_66, %c0_67, %c0_68] : memref<3x32x1xf32, #tpu.memory_space<vmem>>, vector<1x32x1xf32>
    %93 = vector.shape_cast %92 : vector<1x32x1xf32> to vector<32x1xf32>
    %94 = vector.broadcast %93 : vector<32x1xf32> to vector<32x50xf32>
    %95 = vector.broadcast %89 : vector<1x50xf32> to vector<32x50xf32>
    %96 = arith.mulf %94, %95 : vector<32x50xf32>
    %c1_69 = arith.constant 1 : index
    %c0_70 = arith.constant 0 : index
    %c0_71 = arith.constant 0 : index
    %97 = vector.load %arg14[%c1_69, %c0_70, %c0_71] : memref<3x32x1xf32, #tpu.memory_space<vmem>>, vector<1x32x1xf32>
    %98 = vector.shape_cast %97 : vector<1x32x1xf32> to vector<32x1xf32>
    %99 = vector.broadcast %98 : vector<32x1xf32> to vector<32x50xf32>
    %100 = vector.broadcast %85 : vector<1x50xf32> to vector<32x50xf32>
    %101 = arith.mulf %99, %100 : vector<32x50xf32>
    %102 = arith.addf %96, %101 : vector<32x50xf32>
    %c2_72 = arith.constant 2 : index
    %c0_73 = arith.constant 0 : index
    %c0_74 = arith.constant 0 : index
    %103 = vector.load %arg14[%c2_72, %c0_73, %c0_74] : memref<3x32x1xf32, #tpu.memory_space<vmem>>, vector<1x32x1xf32>
    %104 = vector.shape_cast %103 : vector<1x32x1xf32> to vector<32x1xf32>
    %105 = vector.broadcast %104 : vector<32x1xf32> to vector<32x50xf32>
    %106 = vector.broadcast %91 : vector<1x50xf32> to vector<32x50xf32>
    %107 = arith.mulf %105, %106 : vector<32x50xf32>
    %108 = arith.addf %102, %107 : vector<32x50xf32>
    %109 = vector.broadcast %86 : vector<32x1xf32> to vector<32x50xf32>
    %110 = arith.addf %108, %109 : vector<32x50xf32>
    %cst_75 = arith.constant 0.000000e+00 : f32
    %111 = vector.broadcast %cst_75 : f32 to vector<32x50xf32>
    %112 = arith.maximumf %110, %111 : vector<32x50xf32>
    %c0_76 = arith.constant 0 : index
    %c0_77 = arith.constant 0 : index
    %113 = vector.load %arg20[%c0_76, %c0_77] : memref<50x100xf32, #tpu.memory_space<vmem>>, vector<50x100xf32>
    %cst_78 = arith.constant dense<0.000000e+00> : vector<32x100xf32>
    %114 = tpu.matmul %112, %113, %cst_78 {dimension_numbers = #tpu.dot_dimension_numbers<[1], [0], [0], [1], [0, 0, 1, 1], [], []>} : vector<32x50xf32>, vector<50x100xf32>, vector<32x100xf32> -> vector<32x100xf32>
    %c0_79 = arith.constant 0 : index
    %c0_80 = arith.constant 0 : index
    %115 = vector.load %arg17[%c0_79, %c0_80] : memref<8x1xf32, #tpu.memory_space<vmem>>, vector<8x1xf32>
    %cst_81 = arith.constant 0.000000e+00 : f32
    %116 = vector.broadcast %cst_81 : f32 to vector<32x1xf32>
    %117 = vector.extract_strided_slice %114 {offsets = [0, 0], sizes = [32, 99], strides = [1, 1]} : vector<32x100xf32> to vector<32x99xf32>
    %118 = tpu.concatenate %116, %117 in 1 : vector<32x1xf32>, vector<32x99xf32> -> vector<32x100xf32>
    %119 = vector.extract_strided_slice %114 {offsets = [0, 1], sizes = [32, 99], strides = [1, 1]} : vector<32x100xf32> to vector<32x99xf32>
    %120 = tpu.concatenate %119, %116 in 1 : vector<32x99xf32>, vector<32x1xf32> -> vector<32x100xf32>
    %c0_82 = arith.constant 0 : index
    %c0_83 = arith.constant 0 : index
    %c0_84 = arith.constant 0 : index
    %121 = vector.load %arg16[%c0_82, %c0_83, %c0_84] : memref<3x8x32xf32, #tpu.memory_space<vmem>>, vector<1x8x32xf32>
    %122 = vector.shape_cast %121 : vector<1x8x32xf32> to vector<8x32xf32>
    %cst_85 = arith.constant dense<0.000000e+00> : vector<8x100xf32>
    %123 = tpu.matmul %122, %118, %cst_85 {dimension_numbers = #tpu.dot_dimension_numbers<[1], [0], [0], [1], [0, 0, 1, 1], [], []>} : vector<8x32xf32>, vector<32x100xf32>, vector<8x100xf32> -> vector<8x100xf32>
    %c1_86 = arith.constant 1 : index
    %c0_87 = arith.constant 0 : index
    %c0_88 = arith.constant 0 : index
    %124 = vector.load %arg16[%c1_86, %c0_87, %c0_88] : memref<3x8x32xf32, #tpu.memory_space<vmem>>, vector<1x8x32xf32>
    %125 = vector.shape_cast %124 : vector<1x8x32xf32> to vector<8x32xf32>
    %cst_89 = arith.constant dense<0.000000e+00> : vector<8x100xf32>
    %126 = tpu.matmul %125, %114, %cst_89 {dimension_numbers = #tpu.dot_dimension_numbers<[1], [0], [0], [1], [0, 0, 1, 1], [], []>} : vector<8x32xf32>, vector<32x100xf32>, vector<8x100xf32> -> vector<8x100xf32>
    %127 = arith.addf %123, %126 : vector<8x100xf32>
    %c2_90 = arith.constant 2 : index
    %c0_91 = arith.constant 0 : index
    %c0_92 = arith.constant 0 : index
    %128 = vector.load %arg16[%c2_90, %c0_91, %c0_92] : memref<3x8x32xf32, #tpu.memory_space<vmem>>, vector<1x8x32xf32>
    %129 = vector.shape_cast %128 : vector<1x8x32xf32> to vector<8x32xf32>
    %cst_93 = arith.constant dense<0.000000e+00> : vector<8x100xf32>
    %130 = tpu.matmul %129, %120, %cst_93 {dimension_numbers = #tpu.dot_dimension_numbers<[1], [0], [0], [1], [0, 0, 1, 1], [], []>} : vector<8x32xf32>, vector<32x100xf32>, vector<8x100xf32> -> vector<8x100xf32>
    %131 = arith.addf %127, %130 : vector<8x100xf32>
    %132 = vector.broadcast %115 : vector<8x1xf32> to vector<8x100xf32>
    %133 = arith.addf %131, %132 : vector<8x100xf32>
    %cst_94 = arith.constant 0.000000e+00 : f32
    %134 = vector.broadcast %cst_94 : f32 to vector<8x100xf32>
    %135 = arith.maximumf %133, %134 : vector<8x100xf32>
    %c0_95 = arith.constant 0 : index
    %c0_96 = arith.constant 0 : index
    %136 = vector.load %arg21[%c0_95, %c0_96] : memref<100x200xf32, #tpu.memory_space<vmem>>, vector<100x200xf32>
    %cst_97 = arith.constant dense<0.000000e+00> : vector<8x200xf32>
    %137 = tpu.matmul %135, %136, %cst_97 {dimension_numbers = #tpu.dot_dimension_numbers<[1], [0], [0], [1], [0, 0, 1, 1], [], []>} : vector<8x100xf32>, vector<100x200xf32>, vector<8x200xf32> -> vector<8x200xf32>
    %c0_98 = arith.constant 0 : index
    %c0_99 = arith.constant 0 : index
    %138 = vector.load %arg19[%c0_98, %c0_99] : memref<1x1xf32, #tpu.memory_space<vmem>>, vector<1x1xf32>
    %cst_100 = arith.constant 0.000000e+00 : f32
    %139 = vector.broadcast %cst_100 : f32 to vector<8x1xf32>
    %140 = vector.extract_strided_slice %137 {offsets = [0, 0], sizes = [8, 199], strides = [1, 1]} : vector<8x200xf32> to vector<8x199xf32>
    %141 = tpu.concatenate %139, %140 in 1 : vector<8x1xf32>, vector<8x199xf32> -> vector<8x200xf32>
    %142 = vector.extract_strided_slice %137 {offsets = [0, 1], sizes = [8, 199], strides = [1, 1]} : vector<8x200xf32> to vector<8x199xf32>
    %143 = tpu.concatenate %142, %139 in 1 : vector<8x199xf32>, vector<8x1xf32> -> vector<8x200xf32>
    %c0_101 = arith.constant 0 : index
    %c0_102 = arith.constant 0 : index
    %c0_103 = arith.constant 0 : index
    %144 = vector.load %arg18[%c0_101, %c0_102, %c0_103] : memref<3x1x8xf32, #tpu.memory_space<vmem>>, vector<1x1x8xf32>
    %145 = vector.shape_cast %144 : vector<1x1x8xf32> to vector<1x8xf32>
    %cst_104 = arith.constant dense<0.000000e+00> : vector<1x200xf32>
    %146 = tpu.matmul %145, %141, %cst_104 {dimension_numbers = #tpu.dot_dimension_numbers<[1], [0], [0], [1], [0, 0, 1, 1], [], []>} : vector<1x8xf32>, vector<8x200xf32>, vector<1x200xf32> -> vector<1x200xf32>
    %c1_105 = arith.constant 1 : index
    %c0_106 = arith.constant 0 : index
    %c0_107 = arith.constant 0 : index
    %147 = vector.load %arg18[%c1_105, %c0_106, %c0_107] : memref<3x1x8xf32, #tpu.memory_space<vmem>>, vector<1x1x8xf32>
    %148 = vector.shape_cast %147 : vector<1x1x8xf32> to vector<1x8xf32>
    %cst_108 = arith.constant dense<0.000000e+00> : vector<1x200xf32>
    %149 = tpu.matmul %148, %137, %cst_108 {dimension_numbers = #tpu.dot_dimension_numbers<[1], [0], [0], [1], [0, 0, 1, 1], [], []>} : vector<1x8xf32>, vector<8x200xf32>, vector<1x200xf32> -> vector<1x200xf32>
    %150 = arith.addf %146, %149 : vector<1x200xf32>
    %c2_109 = arith.constant 2 : index
    %c0_110 = arith.constant 0 : index
    %c0_111 = arith.constant 0 : index
    %151 = vector.load %arg18[%c2_109, %c0_110, %c0_111] : memref<3x1x8xf32, #tpu.memory_space<vmem>>, vector<1x1x8xf32>
    %152 = vector.shape_cast %151 : vector<1x1x8xf32> to vector<1x8xf32>
    %cst_112 = arith.constant dense<0.000000e+00> : vector<1x200xf32>
    %153 = tpu.matmul %152, %143, %cst_112 {dimension_numbers = #tpu.dot_dimension_numbers<[1], [0], [0], [1], [0, 0, 1, 1], [], []>} : vector<1x8xf32>, vector<8x200xf32>, vector<1x200xf32> -> vector<1x200xf32>
    %154 = arith.addf %150, %153 : vector<1x200xf32>
    %155 = vector.broadcast %138 : vector<1x1xf32> to vector<1x200xf32>
    %156 = arith.addf %154, %155 : vector<1x200xf32>
    %c0_113 = arith.constant 0 : index
    %c0_114 = arith.constant 0 : index
    %c0_115 = arith.constant 0 : index
    %157 = vector.load %arg22[%c0_113, %c0_114, %c0_115] : memref<1x1x200xf32, #tpu.memory_space<vmem>>, vector<1x1x200xf32>
    %158 = vector.shape_cast %157 : vector<1x1x200xf32> to vector<1x200xf32>
    %159 = vector.shape_cast %156 : vector<1x200xf32> to vector<1x1x200xf32>
    tpu.vector_store %arg22[%c0_113, %c0_114, %c0_115], %159 {strides = array<i32>} : memref<1x1x200xf32, #tpu.memory_space<vmem>>, vector<1x1x200xf32>,
    return
  }
  func.func @transform_0(%arg0: i32) -> (i32, i32, i32) {
    %c0_i32 = arith.constant 0 : i32
    %c0_i32_0 = arith.constant 0 : i32
    %c0_i32_1 = arith.constant 0 : i32
    return %arg0, %c0_i32, %c0_i32_0 : i32, i32, i32
  }
  func.func @transform_1(%arg0: i32) -> (i32, i32, i32) {
    %c0_i32 = arith.constant 0 : i32
    %c0_i32_0 = arith.constant 0 : i32
    %c0_i32_1 = arith.constant 0 : i32
    %c0_i32_2 = arith.constant 0 : i32
    return %c0_i32, %c0_i32_0, %c0_i32_1 : i32, i32, i32
  }
  func.func @transform_2(%arg0: i32) -> (i32, i32) {
    %c0_i32 = arith.constant 0 : i32
    %c0_i32_0 = arith.constant 0 : i32
    %c0_i32_1 = arith.constant 0 : i32
    return %c0_i32, %c0_i32_0 : i32, i32
  }
  func.func @transform_3(%arg0: i32) -> (i32, i32, i32) {
    %c0_i32 = arith.constant 0 : i32
    %c0_i32_0 = arith.constant 0 : i32
    %c0_i32_1 = arith.constant 0 : i32
    %c0_i32_2 = arith.constant 0 : i32
    return %c0_i32, %c0_i32_0, %c0_i32_1 : i32, i32, i32
  }
  func.func @transform_4(%arg0: i32) -> (i32, i32) {
    %c0_i32 = arith.constant 0 : i32
    %c0_i32_0 = arith.constant 0 : i32
    %c0_i32_1 = arith.constant 0 : i32
    return %c0_i32, %c0_i32_0 : i32, i32
  }
  func.func @transform_5(%arg0: i32) -> (i32, i32, i32) {
    %c0_i32 = arith.constant 0 : i32
    %c0_i32_0 = arith.constant 0 : i32
    %c0_i32_1 = arith.constant 0 : i32
    %c0_i32_2 = arith.constant 0 : i32
    return %c0_i32, %c0_i32_0, %c0_i32_1 : i32, i32, i32
  }
  func.func @transform_6(%arg0: i32) -> (i32, i32) {
    %c0_i32 = arith.constant 0 : i32
    %c0_i32_0 = arith.constant 0 : i32
    %c0_i32_1 = arith.constant 0 : i32
    return %c0_i32, %c0_i32_0 : i32, i32
  }
  func.func @transform_7(%arg0: i32) -> (i32, i32) {
    %c0_i32 = arith.constant 0 : i32
    %c0_i32_0 = arith.constant 0 : i32
    %c0_i32_1 = arith.constant 0 : i32
    return %c0_i32, %c0_i32_0 : i32, i32
  }
  func.func @transform_8(%arg0: i32) -> (i32, i32) {
    %c0_i32 = arith.constant 0 : i32
    %c0_i32_0 = arith.constant 0 : i32
    %c0_i32_1 = arith.constant 0 : i32
    return %c0_i32, %c0_i32_0 : i32, i32
  }
  func.func @transform_9(%arg0: i32) -> (i32, i32) {
    %c0_i32 = arith.constant 0 : i32
    %c0_i32_0 = arith.constant 0 : i32
    %c0_i32_1 = arith.constant 0 : i32
    return %c0_i32, %c0_i32_0 : i32, i32
  }
  func.func @transform_10(%arg0: i32) -> (i32, i32) {
    %c0_i32 = arith.constant 0 : i32
    %c0_i32_0 = arith.constant 0 : i32
    %c0_i32_1 = arith.constant 0 : i32
    return %c0_i32, %c0_i32_0 : i32, i32
  }
  func.func @transform_11(%arg0: i32) -> (i32, i32) {
    %c0_i32 = arith.constant 0 : i32
    %c0_i32_0 = arith.constant 0 : i32
    %c0_i32_1 = arith.constant 0 : i32
    return %c0_i32, %c0_i32_0 : i32, i32
  }
  func.func @transform_12(%arg0: i32) -> (i32, i32) {
    %c0_i32 = arith.constant 0 : i32
    %c0_i32_0 = arith.constant 0 : i32
    %c0_i32_1 = arith.constant 0 : i32
    return %c0_i32, %c0_i32_0 : i32, i32
  }
  func.func @transform_13(%arg0: i32) -> (i32, i32, i32) {
    %c0_i32 = arith.constant 0 : i32
    %c0_i32_0 = arith.constant 0 : i32
    %c0_i32_1 = arith.constant 0 : i32
    %c0_i32_2 = arith.constant 0 : i32
    return %c0_i32, %c0_i32_0, %c0_i32_1 : i32, i32, i32
  }
  func.func @transform_14(%arg0: i32) -> (i32, i32) {
    %c0_i32 = arith.constant 0 : i32
    %c0_i32_0 = arith.constant 0 : i32
    %c0_i32_1 = arith.constant 0 : i32
    return %c0_i32, %c0_i32_0 : i32, i32
  }
  func.func @transform_15(%arg0: i32) -> (i32, i32, i32) {
    %c0_i32 = arith.constant 0 : i32
    %c0_i32_0 = arith.constant 0 : i32
    %c0_i32_1 = arith.constant 0 : i32
    %c0_i32_2 = arith.constant 0 : i32
    return %c0_i32, %c0_i32_0, %c0_i32_1 : i32, i32, i32
  }
  func.func @transform_16(%arg0: i32) -> (i32, i32) {
    %c0_i32 = arith.constant 0 : i32
    %c0_i32_0 = arith.constant 0 : i32
    %c0_i32_1 = arith.constant 0 : i32
    return %c0_i32, %c0_i32_0 : i32, i32
  }
  func.func @transform_17(%arg0: i32) -> (i32, i32, i32) {
    %c0_i32 = arith.constant 0 : i32
    %c0_i32_0 = arith.constant 0 : i32
    %c0_i32_1 = arith.constant 0 : i32
    %c0_i32_2 = arith.constant 0 : i32
    return %c0_i32, %c0_i32_0, %c0_i32_1 : i32, i32, i32
  }
  func.func @transform_18(%arg0: i32) -> (i32, i32) {
    %c0_i32 = arith.constant 0 : i32
    %c0_i32_0 = arith.constant 0 : i32
    %c0_i32_1 = arith.constant 0 : i32
    return %c0_i32, %c0_i32_0 : i32, i32
  }
  func.func @transform_19(%arg0: i32) -> (i32, i32) {
    %c0_i32 = arith.constant 0 : i32
    %c0_i32_0 = arith.constant 0 : i32
    %c0_i32_1 = arith.constant 0 : i32
    return %c0_i32, %c0_i32_0 : i32, i32
  }
  func.func @transform_20(%arg0: i32) -> (i32, i32) {
    %c0_i32 = arith.constant 0 : i32
    %c0_i32_0 = arith.constant 0 : i32
    %c0_i32_1 = arith.constant 0 : i32
    return %c0_i32, %c0_i32_0 : i32, i32
  }
  func.func @transform_21(%arg0: i32) -> (i32, i32, i32) {
    %c0_i32 = arith.constant 0 : i32
    %c0_i32_0 = arith.constant 0 : i32
    %c0_i32_1 = arith.constant 0 : i32
    return %arg0, %c0_i32, %c0_i32_0 : i32, i32, i32
  }
  func.func @transform_22(%arg0: i32) -> (i32, i32, i32) {
    %c0_i32 = arith.constant 0 : i32
    %c0_i32_0 = arith.constant 0 : i32
    %c0_i32_1 = arith.constant 0 : i32
    return %arg0, %c0_i32, %c0_i32_0 : i32, i32, i32
  }
}

</mosaic_0001>

<bundles_post_ra>
// kernel: autoencoder_forward.1
= control target key start
LH: loop header
LB: loop body
LE: loop exit
PB: predicated region body
PF: predicated region fallthrough
CT: control target
= control target key end

     0   :  { %s4134_s0 = inlined_call_operand.vmem [shape: f32[2,1,200], index: 0, kind: input, shape index: {}]   ;;  %s4135_s1 = inlined_call_operand.vmem [shape: f32[3,8,1], index: 1, kind: input, shape index: {}]   ;;  %s4136_s2 = inlined_call_operand.vmem [shape: f32[8,1], index: 2, kind: input, shape index: {}]   ;;  %s4137_s3 = inlined_call_operand.vmem [shape: f32[3,32,8], index: 3, kind: input, shape index: {}]   ;;  %s4138_s4 = inlined_call_operand.vmem [shape: f32[32,1], index: 4, kind: input, shape index: {}]   ;;  %s4139_s5 = inlined_call_operand.vmem [shape: f32[3,1,32], index: 5, kind: input, shape index: {}]   ;;  %s4140_s6 = inlined_call_operand.<no memory space> [shape: f32[1,1], index: 6, kind: input, shape index: {}]   ;;  %s4141_s7 = inlined_call_operand.vmem [shape: f32[200,100], index: 7, kind: input, shape index: {}]   ;;  %s4142_s8 = inlined_call_operand.vmem [shape: f32[100,50], index: 8, kind: input, shape index: {}]   ;;  %s4143_s9 = inlined_call_operand.vmem [shape: f32[50,50], index: 9, kind: input, shape index: {}]   ;;  %s4144_s10 = inlined_call_operand.vmem [shape: f32[1,50], index: 10, kind: input, shape index: {}]   ;;  %s4145_s11 = inlined_call_operand.vmem [shape: f32[50,50], index: 11, kind: input, shape index: {}]   ;;  %s4146_s12 = inlined_call_operand.vmem [shape: f32[1,50], index: 12, kind: input, shape index: {}]   ;;  %s4147_s13 = inlined_call_operand.vmem [shape: f32[3,32,1], index: 13, kind: input, shape index: {}]   ;;  %s4148_s14 = inlined_call_operand.vmem [shape: f32[32,1], index: 14, kind: input, shape index: {}]   ;;  %s4149_s15 = inlined_call_operand.vmem [shape: f32[3,8,32], index: 15, kind: input, shape index: {}]   ;;  %s4150_s16 = inlined_call_operand.vmem [shape: f32[8,1], index: 16, kind: input, shape index: {}]   ;;  %s4151_s17 = inlined_call_operand.vmem [shape: f32[3,1,8], index: 17, kind: input, shape index: {}]   ;;  %s4152_s19 = inlined_call_operand.vmem [shape: f32[50,100], index: 19, kind: input, shape index: {}]   ;;  %s4153_s20 = inlined_call_operand.vmem [shape: f32[100,200], index: 20, kind: input, shape index: {}]   ;;  %s4154_s21 = inlined_call_operand.vmem [shape: f32[2,1,200], index: 21, kind: output, shape index: {0}]   ;;  %s4155_s22 = inlined_call_operand.hbm [shape: f32[2,1,128], index: 22, kind: output, shape index: {1}]   ;;  %s4156_s18 = inlined_call_operand.<no memory space> [shape: f32[1,1], index: 18, kind: input, shape index: {}]  }
   0x1   :  { %4176 = sst [smem:[#allocation12_spill]] %s4134_s0  ;;  %v30_v1 = vstv %s4156_s18 }
   0x2   :  { %4177 = sst [smem:[#allocation13_spill]] %s4135_s1  ;;  %31 = vst [vmem:[#allocation3] sm:$0x1] %v30_v1 }
   0x3   :  { %4178 = sst [smem:[#allocation14_spill]] %s4136_s2 }
   0x4   :  { %4179 = sst [smem:[#allocation15_spill]] %s4137_s3 }
   0x5   :  { %4180 = sst [smem:[#allocation16_spill]] %s4138_s4 }
   0x6   :  { %4181 = sst [smem:[#allocation17_spill]] %s4139_s5 }
   0x7   :  { %4182 = sst [smem:[#allocation18_spill]] %s4140_s6 }
   0x8   :  { %4183 = sst [smem:[#allocation19_spill]] %s4141_s7 }
   0x9   :  { %4184 = sst [smem:[#allocation20_spill]] %s4142_s8 }
   0xa   :  { %s4185_s29 = sld [smem:[#allocation18_spill]] }
  0x10   :  { %v28_v0 = vstv %s4185_s29 }
  0x11   :  { %29 = vst [vmem:[#allocation2] sm:$0x1] %v28_v0 }
  0x12   :  { %32 = vsyncpa [#allocation5], 0 }
  0x13   :  { %34 = vsyncpa [#allocation5 + $0x1], 0  ;;  %s3403_s0 = smov 0   ;;  %s3405_s23 = smov 0  }
  0x14   :  { %s3407_s1 = smov 0   ;;  %s3409_s5 = smov 0  }
  0x15 LB: > { %4186 = sst [smem:[#allocation7_spill]] %s3261_s0  ;;  %s3424_s18 = sadd.s32 4294967295, %s3273_s5   ;;  %s3273_s5 = sphi %s3409_s5, %s4209_s5   ;;  %s3269_s1 = sphi %s3407_s1, %s4211_s1   ;;  %s3265_s23 = sphi %s3405_s23, %s4213_s23   ;;  %s3261_s0 = sphi %s3403_s0, %s4212_s0  }
  0x16   : > { %4187 = sst [smem:[#allocation8_spill]] %s3269_s1  ;;  %s2799_s24 = sadd.s32 4294967294, %s3273_s5  }
  0x17   : > { %s3428_s6 = sadd.s32 1, %s3273_s5   ;;  %s519_s25 = sadd.s32 1, %s3269_s1 }
  0x18   : > { %4188 = sst [smem:[#allocation9_spill]] %s3428_s6  ;;  %s516_s26 = ssub.s32 %s3273_s5, %s3428_s6 }
  0x19   : > { %p529_p0 = scmp.ne.s32.totalorder %s3269_s1, %s3265_s23  ;;  %p517_p1 = scmp.eq.s32.totalorder %s516_s26, 0 }
  0x1a   : > { %p530_p2 = scmp.eq.s32.totalorder %s3424_s18, 1  ;;  %p535_p3 = scmp.ne.s32.totalorder %s3265_s23, %s3261_s0 }
  0x1b   : > { %p536_p4 = scmp.eq.s32.totalorder %s2799_s24, 1  ;;  %p2802_p7 = scmp.ge.s32.totalorder %s3273_s5, 1 }
  0x1c   : > { %s3439_s2 = scalar_select %p517_p1, %s3269_s1, %s519_s25  }
  0x1d   : > { %p3441_p5 = por %p530_p2, %p529_p0  ;;  %p3445_p6 = por %p536_p4, %p535_p3 }
  0x1e   : > { %4189 = sst [smem:[#allocation10_spill]] %s3439_s2  ;;  %p621_p8 = scmp.lt.s32.totalorder %s3273_s5, 3 }
  0x1f   : > { %s4191_s3 = scalar_select %p3445_p6, 1, 0 }
  0x20   : > { %p622_p9 = pnand %p2802_p7, %p621_p8 }
  0x21   : > { %4192 = sst [smem:[#allocation11_spill]] %s4191_s3  ;;  %p685_p10 = scmp.lt.s32.totalorder (!%p622_p9), %s3424_s18, 1 }
  0x22   : > { %625 = sbr.rel (%p622_p9) target bundleno = 2609 (0xa31), region = 104  ;;  %s4193_s30 = sld [smem:[#allocation13_spill]] (!%p622_p9) }
  0x23   : > { %s4194_s7 = sld [smem:[#allocation19_spill]] (!%p622_p9)  ;;  %s4171_s24 = smov (!%p622_p9), 127  }
  0x24   : > { %s4195_s26 = sld [smem:[#allocation12_spill]] (!%p622_p9)  ;;  %s4198_s29 = smov (!%p622_p9), 1  }
  0x25   : > { %s4197_s3 = sld [smem:[#allocation15_spill]] (!%p622_p9)  ;;  %s2898_s2 = sshll.u32 (!%p622_p9), %s3424_s18, 4 }
  0x26   : > { %s4202_s8 = sld [smem:[#allocation20_spill]] (!%p622_p9)  ;;  %s2718_s6 = scalar_lea.hbm (!%p622_p9), %s4155_s22, %s2898_s2 }
  0x27   : > { %v696_v3 = vlaneseq  ;;  %v3275_v4 = vmov 0   ;;  %s3459_s25 = scalar_select %p685_p10, %s3424_s18, 1  ;;  %v3276_v7 = vmov 0.0   ;;  %vm708_vm0 = vcmask 7168  }
  0x28   : > { %v723_v2 = vld [vmem:[%s4193_s30] sm:$0xff]  ;;  %3211 = vset.pattern.permute.xlu0 %v3275_v4  ;;  %3212 = vset.pattern.permute.xlu1 %v3275_v4  ;;  %v2805_v9 = vld [vmem:[%s4193_s30 + $0x8] sm:$0xff]  ;;  %v2806_v16 = vld [vmem:[%s4193_s30 + $0x10] sm:$0xff]  ;;  %vm721_vm1 = vcmask 580608   ;;  %vm717_vm2 = vcmask 1039360   ;;  %vm805_vm3 = vcmask 588800  }
  0x29   : > { %v795_v5 = vld [vmem:[%s4194_s7 + $0x78] sm:$0xff]  ;;  %726 = vperm.xlu0 %3211, %v723_v2   ;;  %v3462_v6 = vshrl.u32 %v696_v3, 7  ;;  %809 = vmatprep.subr.mxu0 %v3276_v7  ;;  %v794_v8 = vld [vmem:[%s4194_s7 + $0x70] sm:$0xff]  ;;  %s4165_s4 = sshll.u32 %s3459_s25, 1  ;;  %v793_v11 = vld [vmem:[%s4194_s7 + $0x68] sm:$0xff]  ;;  %vm902_vm4 = vcmask 64512  }
  0x2a   : > { %810 = vmatpush1.msra.mxu0 %v795_v5  ;;  %s688_s28 = scalar_lea.vmem %s4195_s26, %s4165_s4  ;;  %v792_v14 = vld [vmem:[%s4194_s7 + $0x60] sm:$0xff]  ;;  %v791_v17 = vld [vmem:[%s4194_s7 + $0x58] sm:$0xff]  ;;  %s4166_s26 = smov 1   ;;  %v790_v19 = vld [vmem:[%s4194_s7 + $0x50] sm:$0xff]  ;;  %vm891_vm6 = vcmask 809984   ;;  %vm1257_vm7 = vcmask 1043456  }
  0x2b   : > { %v3473_v10 = vsub.s32 0, %v3462_v6  ;;  %811 = vmatprep.subr.mxu0 %v3276_v7  ;;  %v702_v12 = vsub.s32 1, %v3462_v6  ;;  %v693_v13 = vld [vmem:[%s688_s28] sm:$0x3]  ;;  %v789_v20 = vld [vmem:[%s4194_s7 + $0x48] sm:$0xff]  ;;  %v787_v22 = vld [vmem:[%s4194_s7 + $0x38] sm:$0xff] }
  0x2c   : > { %812 = vmatpush1.msra.mxu0 %v794_v8  ;;  %v788_v21 = vld [vmem:[%s4194_s7 + $0x40] sm:$0xff]  ;;  %s4196_s4 = sld [smem:[#allocation14_spill]]  ;;  %v786_v24 = vld [vmem:[%s4194_s7 + $0x30] sm:$0xff]  ;;  %v785_v25 = vld [vmem:[%s4194_s7 + $0x28] sm:$0xff]  ;;  %vm1244_vm8 = vcmask 818176   ;;  %vm3279_vm9 = vmmov 0  }
  0x2d   : > { %743 = vperm.xlu0 %3211, %v2805_v9   ;;  %813 = vmatprep.subr.mxu0 %v3276_v7  ;;  %v3490_v15 = vrot.slane %v693_v13, %v3473_v10  ;;  %v3501_v18 = vrot.slane %v693_v13, %v702_v12  ;;  %v784_v26 = vld [vmem:[%s4194_s7 + $0x20] sm:$0xff]  ;;  %v783_v27 = vld [vmem:[%s4194_s7 + $0x18] sm:$0xff]  ;;  %v782_v28 = vld [vmem:[%s4194_s7 + $0x10] sm:$0xff]  ;;  %vm1387_vm10 = vcmask 261120   ;;  %vm1379_vm11 = vcmask 400384   ;;  %s4205_s30 = sand.u32 1, %s3265_s23  }
  0x2e   : > { %814 = vmatpush1.msra.mxu0 %v793_v11  ;;  %v781_v29 = vld [vmem:[%s4194_s7 + $0x8] sm:$0xff]  ;;  %v780_v30 = vld [vmem:[%s4194_s7] sm:$0xff]  ;;  %v803_v32 = vld [vmem:[%s4194_s7 + $0xb8] sm:$0xff]  ;;  %vm1632_vm12 = vcmask 1041408   ;;  %vm1628_vm13 = vcmask 408576   ;;  %s2705_s28 = scalar_lea.sflag [#allocation5], %s4205_s30 }
  0x2f   : > { %815 = vmatprep.subr.mxu0 %v3276_v7  ;;  %704 = vrot.lane.b32.xlu1 %v3490_v15, %s4166_s26  ;;  %v804_v31 = vld [vmem:[%s4194_s7 + $0xc0] sm:$0xff]  ;;  %v802_v33 = vld [vmem:[%s4194_s7 + $0xb0] sm:$0xff]  ;;  %v801_v34 = vld [vmem:[%s4194_s7 + $0xa8] sm:$0xff] }
  0x30   : > { %816 = vmatpush1.msra.mxu0 %v792_v14  ;;  %v800_v35 = vld [vmem:[%s4194_s7 + $0xa0] sm:$0xff]  ;;  %v799_v36 = vld [vmem:[%s4194_s7 + $0x98] sm:$0xff]  ;;  %v798_v37 = vld [vmem:[%s4194_s7 + $0x90] sm:$0xff] }
  0x31   : > { %756 = vperm.xlu0 %3211, %v2806_v16   ;;  %817 = vmatprep.subr.mxu0 %v3276_v7  ;;  %v797_v38 = vld [vmem:[%s4194_s7 + $0x88] sm:$0xff]  ;;  %v796_v39 = vld [vmem:[%s4194_s7 + $0x80] sm:$0xff]  ;;  %s4199_s7 = sld [smem:[#allocation16_spill]]  ;;  %vm3639_vm5 = vmneg %vm708_vm0 }
  0x32   : > { %818 = vmatpush1.msra.mxu0 %v791_v17  ;;  %v694_v23 = vld [vmem:[%s4196_s4] sm:$0xff]  ;;  %v2809_v13 = vld [vmem:[%s4197_s3 + $0x28] sm:$0xff]  ;;  %v2810_v17 = vld [vmem:[%s4197_s3 + $0x30] sm:$0xff]  ;;  %s4203_s4 = sld [smem:[#allocation17_spill]] }
  0x33   : > { %819 = vmatprep.subr.mxu0 %v3276_v7  ;;  %706 = vrot.lane.b32.xlu1 %v3501_v18, %s4166_s26  ;;  %v2808_v9 = vld [vmem:[%s4197_s3 + $0x20] sm:$0xff]  ;;  %s4175_s26 = sand.u32 1, %s3265_s23  }
  0x34   : > { %820 = vmatpush1.msra.mxu0 %v790_v19  ;;  %v893_v11 = vld [vmem:[%s4197_s3] sm:$0xff]  ;;  %s3913_s1 = scalar_lea.vmem [#allocation4], %s4175_s26 }
  0x35   : > { %713 = vrot.lane.b32.xlu0 %v3490_v15, %s4171_s24  ;;  %821 = vmatprep.subr.mxu0 %v3276_v7 }
  0x36   : > { %822 = vmatpush1.msra.mxu0 %v789_v20  ;;  %3000 = vmatprep.mubr.msk.f32.mxu1 %vm902_vm4, %v893_v11 }
  0x37   : > { %823 = vmatprep.subr.mxu0 %v3276_v7  ;;  %715 = vrot.lane.b32.xlu1 %v3501_v18, %s4171_s24  ;;  %v879_v16 = vld [vmem:[%s4199_s7] sm:$0xff]  ;;  %v882_v19 = vld [vmem:[%s4199_s7 + $0x18] sm:$0xff]  ;;  %v881_v20 = vld [vmem:[%s4199_s7 + $0x10] sm:$0xff] }
  0x38   : > { %824 = vmatpush1.msra.mxu0 %v788_v21 }
  0x39   : > { %825 = vmatprep.subr.mxu0 %v3276_v7 }
  0x3a   : > { %826 = vmatpush1.msra.mxu0 %v787_v22 }
  0x3b   : > { %827 = vmatprep.subr.mxu0 %v3276_v7  ;;  %773 = vperm.xlu1 %3212, %v694_v23   ;;  %v894_v23 = vld [vmem:[%s4197_s3 + $0x8] sm:$0xff] }
  0x3c   : > { %828 = vmatpush1.msra.mxu0 %v786_v24  ;;  %v895_v24 = vld [vmem:[%s4197_s3 + $0x10] sm:$0xff] }
  0x3d   : > { %829 = vmatprep.subr.mxu0 %v3276_v7 }
  0x3e   : > { %830 = vmatpush1.msra.mxu0 %v785_v25 }
  0x3f   : > { %831 = vmatprep.subr.mxu0 %v3276_v7 }
  0x40   : > { %832 = vmatpush1.msra.mxu0 %v784_v26  ;;  %v1243_v26 = vld [vmem:[%s4202_s8 + $0x60] sm:$0xf] }
  0x41   : > { %833 = vmatprep.subr.mxu0 %v3276_v7 }
  0x42   : > { %834 = vmatpush1.msra.mxu0 %v783_v27  ;;  %v896_v27 = vld [vmem:[%s4197_s3 + $0x18] sm:$0xff] }
  0x43   : > { %835 = vmatprep.subr.mxu0 %v3276_v7 }
  0x44   : > { %836 = vmatpush1.msra.mxu0 %v782_v28  ;;  %v2822_v28 = vld [vmem:[%s4197_s3 + $0x40] sm:$0xff] }
  0x45   : > { %837 = vmatprep.subr.mxu0 %v3276_v7 }
  0x46   : > { %838 = vmatpush1.msra.mxu0 %v781_v29  ;;  %v2823_v29 = vld [vmem:[%s4197_s3 + $0x48] sm:$0xff] }
  0x47   : > { %839 = vmatprep.subr.mxu0 %v3276_v7 }
  0x48   : > { %840 = vmatpush1.msra.mxu0 %v780_v30  ;;  %v2824_v30 = vld [vmem:[%s4197_s3 + $0x50] sm:$0xff] }
  0x49   : > { %855 = vmatprep.subr.mxu0 %v3276_v7 }
  0x4a   : > { %856 = vmatpush2.msra.mxu0 %v804_v31  ;;  %v1242_v31 = vld [vmem:[%s4202_s8 + $0x58] sm:$0xff] }
  0x4b   : > { %857 = vmatprep.subr.mxu0 %v3276_v7 }
  0x4c   : > { %858 = vmatpush2.msra.mxu0 %v803_v32  ;;  %v2825_v32 = vld [vmem:[%s4197_s3 + $0x58] sm:$0xff] }
  0x4d   : > { %859 = vmatprep.subr.mxu0 %v3276_v7 }
  0x4e   : > { %860 = vmatpush2.msra.mxu0 %v802_v33  ;;  %v1241_v33 = vld [vmem:[%s4202_s8 + $0x50] sm:$0xff] }
  0x4f   : > { %861 = vmatprep.subr.mxu0 %v3276_v7 }
  0x50   : > { %862 = vmatpush2.msra.mxu0 %v801_v34  ;;  %v1240_v34 = vld [vmem:[%s4202_s8 + $0x48] sm:$0xff] }
  0x51   : > { %863 = vmatprep.subr.mxu0 %v3276_v7 }
  0x52   : > { %864 = vmatpush2.msra.mxu0 %v800_v35  ;;  %v1239_v35 = vld [vmem:[%s4202_s8 + $0x40] sm:$0xff] }
  0x53   : > { %865 = vmatprep.subr.mxu0 %v3276_v7 }
  0x54   : > { %866 = vmatpush2.msra.mxu0 %v799_v36  ;;  %v1238_v36 = vld [vmem:[%s4202_s8 + $0x38] sm:$0xff] }
  0x55   : > { %867 = vmatprep.subr.mxu0 %v3276_v7 }
  0x56   : > { %868 = vmatpush2.msra.mxu0 %v798_v37  ;;  %v1237_v37 = vld [vmem:[%s4202_s8 + $0x30] sm:$0xff] }
  0x57   : > { %869 = vmatprep.subr.mxu0 %v3276_v7 }
  0x58   : > { %870 = vmatpush2.msra.mxu0 %v797_v38  ;;  %v1236_v38 = vld [vmem:[%s4202_s8 + $0x28] sm:$0xff] }
  0x59   : > { %871 = vmatprep.subr.mxu0 %v3276_v7 }
  0x5a   : > { %872 = vmatpush2.msra.mxu0 %v796_v39  ;;  %v1235_v39 = vld [vmem:[%s4202_s8 + $0x20] sm:$0xff] }
  0xa1   : > { %v705_v40 = vpop.permute.xlu1 %704 }
  0xa2   : > { %v712_v46 = vsel %vm708_vm0, 0.0, %v705_v40 }
  0xa3   : > { %v732_v50 = vrot.slane %v712_v46, %v3473_v10 }
  0xa4   : > { %v727_v41 = vpop.permute.xlu0 %726 }
  0xa5   : > { %v707_v42 = vpop.permute.xlu1 %706  ;;  %v737_v57 = vmul.f32 %v732_v50, %v727_v41 }
  0xa6   : > { %v709_v44 = vsel %vm708_vm0, %v705_v40, %v707_v42  ;;  %v1234_v40 = vld [vmem:[%s4202_s8 + $0x18] sm:$0xff]  ;;  %v1232_v42 = vld [vmem:[%s4202_s8 + $0x8] sm:$0xff] }
  0xa7   : > { %v736_v48 = vrot.slane %v709_v44, %v3473_v10 }
  0xa8   : > { %v744_v43 = vpop.permute.xlu0 %743 }
  0xa9   : > { %v716_v45 = vpop.permute.xlu1 %715  ;;  %v738_v52 = vmul.f32 %v736_v48, %v727_v41  ;;  %v748_v53 = vmul.f32 %v744_v43, %v3490_v15  ;;  %v749_v54 = vmul.f32 %v744_v43, %v3501_v18  ;;  %v880_v15 = vld [vmem:[%s4199_s7 + $0x8] sm:$0xff]  ;;  %v2811_v18 = vld [vmem:[%s4197_s3 + $0x38] sm:$0xff]  ;;  %v1233_v41 = vld [vmem:[%s4202_s8 + $0x10] sm:$0xff]  ;;  %s2720_s7 = sshll.u32 %s3913_s1, 4  ;;  %s2721_s7 = int_to_ptr.vmem [resolvable:$true] %s2720_s7 }
  0xaa   : > { %v722_v47 = vsel %vm721_vm1, %v716_v45, 0.0  ;;  %v1231_v43 = vld [vmem:[%s4202_s8] sm:$0xff]  ;;  %s3213_s0 = scalar_lea.vmem %s2721_s7, 16 }
  0xab   : > { %v766_v51 = vrot.slane %v722_v47, %v3473_v10  ;;  %v750_v60 = vadd.f32 %v748_v53, %v737_v57  ;;  %v751_v61 = vadd.f32 %v749_v54, %v738_v52  ;;  %p3214_p11 = scmp.ne.s32.totalorder %s2721_s7, %s3213_s0 }
  0xac   : > { %v757_v49 = vpop.permute.xlu0 %756 }
  0xad   : > { %v768_v58 = vmul.f32 %v766_v51, %v757_v49  ;;  %p3215_p12 = pnand %p3214_p11, %p3441_p5 }
  0xaf   : > { %v770_v63 = vadd.f32 %v768_v58, %v751_v61  ;;  %p3216_p13 = pneg %p3215_p12 }
  0xb0   : > { %v714_v55 = vpop.permute.xlu0 %713 }
  0xb1   : > { %v718_v56 = vsel %vm717_vm2, %v714_v55, %v716_v45 }
  0xb2   : > { %v762_v59 = vrot.slane %v718_v56, %v3473_v10 }
  0xb4   : > { %v767_v62 = vmul.f32 %v762_v59, %v757_v49 }
  0xb6   : > { %v769_v0 = vadd.f32 %v767_v62, %v750_v60  ;;  %v774_v1 = vpop.permute.xlu1 %773 }
  0xb7   : > { %v777_v4 = vadd.f32 %v774_v1, %v770_v63 }
  0xb8   : > { %v776_v2 = vadd.f32 %v774_v1, %v769_v0 }
  0xb9   : > { %v779_v8 = vmax.f32 %v777_v4, 0.0 }
  0xba   : > { %v778_v5 = vmax.f32 %v776_v2, 0.0 }
  0xbb   : > { %2807 = vmatprep.mubr.msk.f32.mxu0 %vm805_vm3, %v779_v8 }
  0xbc   : > { %874 = vmatmul.mubr.f32.vlgmr.msra.gmra.mxu0 %v778_v5 }
  0xbd   : > { %2992 = vmatprep.mubr.msk.f32.mxu0 %vm902_vm4, %v2808_v9 }
 0x17c   : > { %v875_v12 = vpop.f32.mrf.mxu0 }
 0x17d   : > { %888 = vrot.lane.b32.xlu1 %v875_v12, %s4171_s24  ;;  %884 = vrot.lane.b32.xlu0 %v875_v12, %s4198_s29 }
 0x17e   : > { %2990 = vmatprep.subr.mxu0 %v875_v12  ;;  %v877_v14 = vpop.f32.mrf.mxu0 }
 0x17f   : > { %2991 = vmatpush3.msra.mxu0 %v875_v12 }
 0x180   : > { %2993 = vmatmul.mubr.msk.f32.vlgmr.msra.gmra.mxu0 %vm902_vm4, %v2809_v13  ;;  %3057 = vmatprep.subr.mxu0 %v3276_v7 }
 0x181   : > { %1210 = vperm.xlu1 %3212, %v880_v15   ;;  %1205 = vperm.xlu0 %3211, %v879_v16  }
 0x182   : > { %2995 = vmatprep.mubr.msk.f32.mxu0 %vm902_vm4, %v2810_v17 }
 0x184   : > { %2996 = vmatmul.mubr.msk.f32.gmra.mxu0 %vm902_vm4, %v2811_v18 }
 0x185   : > { %1220 = vperm.xlu1 %3212, %v882_v19   ;;  %1215 = vperm.xlu0 %3211, %v881_v20   ;;  %v2836_v20 = vld [vmem:[%s4203_s4 + $0x1] sm:$0x1] }
 0x186   : > { %3065 = vmatprep.mubr.msk.f32.mxu0 %vm3279_vm9, %v3276_v7 }
 0x1ef   : > { %v885_v22 = vpop.permute.xlu0 %884  ;;  %v889_v25 = vpop.permute.xlu1 %888 }
 0x1f0   : > { %2998 = vmatprep.subr.msk.mxu1 %vm3639_vm5, %v885_v22 }
 0x1f1   : > { %2999 = vmatpush3.msk.msra.mxu1 %vm3639_vm5, %v885_v22  ;;  %v1802_v22 = vld [vmem:[%s4147_s13] sm:$0xff] }
 0x1f2   : > { %3001 = vmatmul.mubr.msk.f32.vlgmr.msra.gmra.mxu1 %vm902_vm4, %v894_v23  ;;  %3006 = vmatprep.subr.msk.mxu1 %vm891_vm6, %v889_v25  ;;  %v1346_v23 = vld [vmem:[#allocation2] sm:$0x1] }
 0x1f3   : > { %3007 = vmatpush3.msk.msra.mxu1 %vm891_vm6, %v889_v25  ;;  %3003 = vmatprep.mubr.msk.f32.mxu1 %vm902_vm4, %v895_v24  ;;  %v1803_v24 = vld [vmem:[%s4147_s13 + $0x8] sm:$0xff]  ;;  %v2857_v25 = vld [vmem:[%s4147_s13 + $0x20] sm:$0xff] }
 0x1f4   : > { %3014 = vmatprep.subr.msk.mxu1 %vm1257_vm7, %v1243_v26 }
 0x1f6   : > { %3004 = vmatmul.mubr.msk.f32.gmra.mxu1 %vm902_vm4, %v896_v27  ;;  %v2858_v27 = vld [vmem:[%s4147_s13 + $0x28] sm:$0xff] }
 0x1f7   : > { %3008 = vmatprep.mubr.msk.f32.mxu1 %vm902_vm4, %v2822_v28  ;;  %v1804_v28 = vld [vmem:[%s4147_s13 + $0x10] sm:$0xff] }
 0x1fa   : > { %3009 = vmatmul.mubr.msk.f32.vlgmr.msra.gmra.mxu1 %vm902_vm4, %v2823_v29  ;;  %v2861_v29 = vld [vmem:[%s4147_s13 + $0x40] sm:$0xff] }
 0x1fb   : > { %3011 = vmatprep.mubr.msk.f32.mxu1 %vm902_vm4, %v2824_v30  ;;  %3015 = vmatpush3.msk.msra.mxu1 %vm1257_vm7, %v1243_v26  ;;  %v2862_v26 = vld [vmem:[%s4147_s13 + $0x48] sm:$0xff]  ;;  %v1805_v30 = vld [vmem:[%s4147_s13 + $0x18] sm:$0xff] }
 0x1fc   : > { %3016 = vmatprep.subr.mxu1 %v1242_v31  ;;  %v1211_v53 = vpop.permute.xlu1 %1210  ;;  %v1206_v54 = vpop.permute.xlu0 %1205 }
 0x1fd   : > { %3017 = vmatpush3.msra.mxu1 %v1242_v31  ;;  %v2859_v31 = vld [vmem:[%s4147_s13 + $0x30] sm:$0xff] }
 0x1fe   : > { %3012 = vmatmul.mubr.msk.f32.gmra.mxu1 %vm902_vm4, %v2825_v32  ;;  %3018 = vmatprep.subr.mxu1 %v1241_v33  ;;  %v2863_v32 = vld [vmem:[%s4147_s13 + $0x50] sm:$0xff] }
 0x1ff   : > { %3019 = vmatpush3.msra.mxu1 %v1241_v33  ;;  %v2860_v33 = vld [vmem:[%s4147_s13 + $0x38] sm:$0xff] }
 0x200   : > { %3020 = vmatprep.subr.mxu1 %v1240_v34  ;;  %v1221_v4 = vpop.permute.xlu1 %1220  ;;  %v1216_v9 = vpop.permute.xlu0 %1215 }
 0x201   : > { %3021 = vmatpush3.msra.mxu1 %v1240_v34  ;;  %v1789_v34 = vld [vmem:[%s4148_s14] sm:$0xff] }
 0x202   : > { %3022 = vmatprep.subr.mxu1 %v1239_v35 }
 0x203   : > { %3023 = vmatpush3.msra.mxu1 %v1239_v35 }
 0x204   : > { %3024 = vmatprep.subr.mxu1 %v1238_v36 }
 0x205   : > { %3025 = vmatpush3.msra.mxu1 %v1238_v36 }
 0x206   : > { %3026 = vmatprep.subr.mxu1 %v1237_v37 }
 0x207   : > { %3027 = vmatpush3.msra.mxu1 %v1237_v37 }
 0x208   : > { %3028 = vmatprep.subr.mxu1 %v1236_v38 }
 0x209   : > { %3029 = vmatpush3.msra.mxu1 %v1236_v38 }
 0x20a   : > { %3030 = vmatprep.subr.mxu1 %v1235_v39 }
 0x20b   : > { %3031 = vmatpush3.msra.mxu1 %v1235_v39  ;;  %v1384_v39 = vld [vmem:[%s4203_s4] sm:$0x1] }
 0x20c   : > { %3032 = vmatprep.subr.mxu1 %v1234_v40 }
 0x20d   : > { %3033 = vmatpush3.msra.mxu1 %v1234_v40 }
 0x20e   : > { %3034 = vmatprep.subr.mxu1 %v1233_v41 }
 0x20f   : > { %3035 = vmatpush3.msra.mxu1 %v1233_v41  ;;  %v1626_v41 = vld [vmem:[%s4143_s9 + $0x30] sm:$0x3] }
 0x210   : > { %3036 = vmatprep.subr.mxu1 %v1232_v42 }
 0x211   : > { %3037 = vmatpush3.msra.mxu1 %v1232_v42 }
 0x212   : > { %3038 = vmatprep.subr.mxu1 %v1231_v43 }
 0x213   : > { %3039 = vmatpush3.msra.mxu1 %v1231_v43 }
 0x214   : > { %3046 = vmatprep.subr.mxu1 %v3276_v7 }
 0x240   : > { %v2994_v44 = vpop.f32.mrf.mxu0 }
 0x242   : > { %v981_v46 = vpop.f32.mrf.mxu0 }
 0x244   : > { %v2997_v49 = vpop.f32.mrf.mxu0 }
 0x246   : > { %v991_v57 = vpop.f32.mrf.mxu0 }
 0x2b2   : > { %v3002_v45 = vpop.f32.mrf.mxu1 }
 0x2b3   : > { %v1084_v51 = vadd.f32 %v3002_v45, %v2994_v44  ;;  %v2847_v44 = vld [vmem:[%s4203_s4 + $0x2] sm:$0x1]  ;;  %s3280_s4 = smov [#allocation4]  }
 0x2b4   : > { %v1078_v47 = vpop.f32.mrf.mxu1 }
 0x2b5   : > { %v1079_v55 = vadd.f32 %v1078_v47, %v981_v46  ;;  %v1714_v46 = vld [vmem:[%s4145_s11 + $0x30] sm:$0x3]  ;;  %v1625_v47 = vld [vmem:[%s4143_s9 + $0x28] sm:$0xff] }
 0x2b6   : > { %v3005_v48 = vpop.f32.mrf.mxu1 }
 0x2b7   : > { %v1094_v59 = vadd.f32 %v3005_v48, %v2997_v49  ;;  %v1713_v48 = vld [vmem:[%s4145_s11 + $0x28] sm:$0xff]  ;;  %v1624_v49 = vld [vmem:[%s4143_s9 + $0x20] sm:$0xff] }
 0x2b8   : > { %v1088_v50 = vpop.f32.mrf.mxu1 }
 0x2b9   : > { %v1089_v63 = vadd.f32 %v1088_v50, %v991_v57  ;;  %v1712_v50 = vld [vmem:[%s4145_s11 + $0x20] sm:$0xff] }
 0x2ba   : > { %v3010_v52 = vpop.f32.mrf.mxu1  ;;  %v1620_v57 = vld [vmem:[%s4143_s9] sm:$0xff] }
 0x2bb   : > { %v1200_v56 = vadd.f32 %v3010_v52, %v1084_v51  ;;  %v1623_v51 = vld [vmem:[%s4143_s9 + $0x18] sm:$0xff] }
 0x2bc   : > { %v1180_v58 = vpop.f32.mrf.mxu1  ;;  %v1711_v52 = vld [vmem:[%s4145_s11 + $0x18] sm:$0xff] }
 0x2bd   : > { %v1199_v60 = vadd.f32 %v1180_v58, %v1079_v55  ;;  %v1224_v61 = vadd.f32 %v1211_v53, %v1200_v56  ;;  %v1622_v53 = vld [vmem:[%s4143_s9 + $0x10] sm:$0xff]  ;;  %v1621_v55 = vld [vmem:[%s4143_s9 + $0x8] sm:$0xff]  ;;  %v1708_v58 = vld [vmem:[%s4145_s11] sm:$0xff] }
 0x2be   : > { %v3013_v62 = vpop.f32.mrf.mxu1  ;;  %v1709_v56 = vld [vmem:[%s4145_s11 + $0x8] sm:$0xff] }
 0x2bf   : > { %v1223_v0 = vadd.f32 %v1206_v54, %v1199_v60  ;;  %v1202_v1 = vadd.f32 %v3013_v62, %v1094_v59  ;;  %v1228_v11 = vmax.f32 %v1224_v61, 0.0  ;;  %v1710_v54 = vld [vmem:[%s4145_s11 + $0x10] sm:$0xff] }
 0x2c0   : > { %v1190_v2 = vpop.f32.mrf.mxu1 }
 0x2c1   : > { %v1227_v5 = vmax.f32 %v1223_v0, 0.0  ;;  %v1201_v8 = vadd.f32 %v1190_v2, %v1089_v63  ;;  %v1226_v12 = vadd.f32 %v1221_v4, %v1202_v1 }
 0x2c3   : > { %v1225_v13 = vadd.f32 %v1216_v9, %v1201_v8  ;;  %3040 = vmatprep.mubr.msk.f32.mxu1 %vm1244_vm8, %v1227_v5  ;;  %v1230_v15 = vmax.f32 %v1226_v12, 0.0  ;;  %v1942_v9 = vld [vmem:[%s4152_s19 + $0x30] sm:$0x3]  ;;  %v1940_v12 = vld [vmem:[%s4152_s19 + $0x20] sm:$0xff] }
 0x2c4   : > { %3041 = vmatmul.mubr.msk.f32.vlgmr.msra.gmra.mxu1 %vm1244_vm8, %v1228_v11  ;;  %v1941_v11 = vld [vmem:[%s4152_s19 + $0x28] sm:$0xff] }
 0x2c5   : > { %v1229_v14 = vmax.f32 %v1225_v13, 0.0  ;;  %v1939_v13 = vld [vmem:[%s4152_s19 + $0x18] sm:$0xff] }
 0x2c7   : > { %3043 = vmatprep.mubr.msk.f32.mxu1 %vm1244_vm8, %v1229_v14  ;;  %v1627_v14 = vld [vmem:[%s4144_s10] sm:$0x1] }
 0x2c8   : > { %3044 = vmatmul.mubr.msk.f32.gmra.mxu1 %vm1244_vm8, %v1230_v15  ;;  %v1715_v15 = vld [vmem:[%s4146_s12] sm:$0x1] }
 0x2c9   : > { %3054 = vmatprep.mubr.msk.f32.mxu1 %vm3279_vm9, %v3276_v7 }
 0x384   : > { %v3042_v16 = vpop.f32.mrf.mxu1 }
 0x385   : > { %1353 = vrot.lane.b32.xlu1 %v3042_v16, %s4198_s29 }
 0x386   : > { %v1327_v17 = vpop.f32.mrf.mxu1 }
 0x388   : > { %v3045_v18 = vpop.f32.mrf.mxu1 }
 0x389   : > { %1357 = vrot.lane.b32.xlu0 %v3045_v18, %s4198_s29  ;;  %3047 = vmatpush3.msra.mxu1 %v3045_v18 }
 0x38a   : > { %v1337_v19 = vpop.f32.mrf.mxu1  ;;  %3048 = vmatprep.subr.mxu1 %v3276_v7 }
 0x38b   : > { %1355 = vrot.lane.b32.xlu1 %v1337_v19, %s4198_s29  ;;  %3049 = vmatpush3.msra.mxu1 %v1337_v19 }
 0x38c   : > { %3050 = vmatprep.subr.mxu1 %v3276_v7 }
 0x38d   : > { %1373 = vrot.lane.b32.xlu0 %v3045_v18, %s4171_s24  ;;  %3051 = vmatpush3.msra.mxu1 %v3042_v16 }
 0x38e   : > { %3052 = vmatprep.subr.mxu1 %v3276_v7 }
 0x38f   : > { %1351 = vrot.lane.b32.xlu1 %v1327_v17, %s4198_s29  ;;  %3053 = vmatpush3.msra.mxu1 %v1327_v17 }
 0x390   : > { %3068 = vmatprep.subr.mxu1 %v3276_v7  ;;  %3055 = vmatmul.mubr.msk.f32.vlgmr.msra.gmra.mxu1 %vm1387_vm10, %v2836_v20 }
 0x391   : > { %1371 = vrot.lane.b32.xlu0 %v1337_v19, %s4171_s24  ;;  %3076 = vmatprep.mubr.msk.f32.mxu1 %vm3279_vm9, %v3276_v7 }
 0x393   : > { %1367 = vrot.lane.b32.xlu1 %v1327_v17, %s4171_s24 }
 0x395   : > { %1369 = vrot.lane.b32.xlu0 %v3042_v16, %s4171_s24  ;;  %v1938_v16 = vld [vmem:[%s4152_s19 + $0x10] sm:$0xff]  ;;  %s4204_s24 = smov 127  }
 0x397   : > { %1808 = vperm.xlu1 %3212, %v1802_v22  }
 0x399   : > { %1612 = vperm.xlu0 %3211, %v1346_v23  }
 0x39b   : > { %1813 = vperm.xlu1 %3212, %v1803_v24  }
 0x39d   : > { %1841 = vperm.xlu0 %3211, %v2857_v25   ;;  %v1937_v25 = vld [vmem:[%s4152_s19 + $0x8] sm:$0xff] }
 0x39f   : > { %1883 = vperm.xlu1 %3212, %v2862_v26   ;;  %v1790_v26 = vld [vmem:[%s4148_s14 + $0x8] sm:$0xff] }
 0x3a1   : > { %1846 = vperm.xlu0 %3211, %v2858_v27   ;;  %v2864_v27 = vld [vmem:[%s4147_s13 + $0x58] sm:$0xff] }
 0x3a3   : > { %1818 = vperm.xlu1 %3212, %v1804_v28   ;;  %v1936_v28 = vld [vmem:[%s4152_s19] sm:$0xff] }
 0x3a5   : > { %1878 = vperm.xlu0 %3211, %v2861_v29   ;;  %v1792_v29 = vld [vmem:[%s4148_s14 + $0x18] sm:$0xff] }
 0x3a7   : > { %1823 = vperm.xlu1 %3212, %v1805_v30   ;;  %v1791_v30 = vld [vmem:[%s4148_s14 + $0x10] sm:$0xff] }
 0x3a9   : > { %1851 = vperm.xlu0 %3211, %v2859_v31  }
 0x3ab   : > { %1888 = vperm.xlu1 %3212, %v2863_v32  }
 0x3ad   : > { %1856 = vperm.xlu0 %3211, %v2860_v33  }
 0x3b1   : > { %1910 = vperm.xlu0 %3211, %v1789_v34  }
 0x3f7   : > { %v1354_v35 = vpop.permute.xlu1 %1353 }
 0x3fb   : > { %v1358_v36 = vpop.permute.xlu0 %1357 }
 0x3fc   : > { %3058 = vmatpush3.msk.msra.mxu0 %vm3639_vm5, %v1358_v36 }
 0x3fd   : > { %3059 = vmatprep.subr.mxu0 %v3276_v7  ;;  %v1356_v37 = vpop.permute.xlu1 %1355 }
 0x3fe   : > { %3060 = vmatpush3.msk.msra.mxu0 %vm3639_vm5, %v1356_v37 }
 0x3ff   : > { %v1374_v38 = vpop.permute.xlu0 %1373  ;;  %3061 = vmatprep.subr.mxu0 %v3276_v7 }
 0x400   : > { %3062 = vmatpush3.msk.msra.mxu0 %vm3639_vm5, %v1354_v35  ;;  %3069 = vmatpush3.msk.msra.mxu1 %vm1379_vm11, %v1374_v38 }
 0x401   : > { %3063 = vmatprep.subr.mxu0 %v3276_v7  ;;  %v1352_v40 = vpop.permute.xlu1 %1351  ;;  %3070 = vmatprep.subr.mxu1 %v3276_v7 }
 0x402   : > { %3064 = vmatpush3.msk.msra.mxu0 %vm3639_vm5, %v1352_v40 }
 0x403   : > { %v1372_v42 = vpop.permute.xlu0 %1371  ;;  %3066 = vmatmul.mubr.msk.f32.vlgmr.msra.gmra.mxu0 %vm1387_vm10, %v1384_v39  ;;  %3079 = vmatprep.subr.mxu0 %v3276_v7 }
 0x404   : > { %3071 = vmatpush3.msk.msra.mxu1 %vm1379_vm11, %v1372_v42  ;;  %3080 = vmatpush3.msk.msra.mxu0 %vm1632_vm12, %v1626_v41 }
 0x405   : > { %3072 = vmatprep.subr.mxu1 %v3276_v7  ;;  %3081 = vmatprep.subr.mxu0 %v3276_v7  ;;  %v1368_v45 = vpop.permute.xlu1 %1367 }
 0x406   : > { %3093 = vmatprep.mubr.msk.f32.mxu0 %vm3279_vm9, %v3276_v7  ;;  %3082 = vmatpush3.msra.mxu0 %v1625_v47 }
 0x407   : > { %v1370_v43 = vpop.permute.xlu0 %1369  ;;  %3083 = vmatprep.subr.mxu0 %v3276_v7 }
 0x408   : > { %3073 = vmatpush3.msk.msra.mxu1 %vm1379_vm11, %v1370_v43  ;;  %3084 = vmatpush3.msra.mxu0 %v1624_v49 }
 0x409   : > { %3074 = vmatprep.subr.mxu1 %v3276_v7  ;;  %3085 = vmatprep.subr.mxu0 %v3276_v7 }
 0x40a   : > { %3075 = vmatpush3.msk.msra.mxu1 %vm1379_vm11, %v1368_v45  ;;  %3086 = vmatpush3.msra.mxu0 %v1623_v51 }
 0x40b   : > { %3077 = vmatmul.mubr.msk.f32.vlgmr.msra.gmra.mxu1 %vm1387_vm10, %v2847_v44  ;;  %3096 = vmatprep.subr.mxu1 %v3276_v7 }
 0x40c   : > { %3097 = vmatpush3.msk.msra.mxu1 %vm1632_vm12, %v1714_v46  ;;  %3110 = vmatprep.mubr.msk.f32.mxu1 %vm3279_vm9, %v3276_v7 }
 0x40d   : > { %3098 = vmatprep.subr.mxu1 %v3276_v7  ;;  %3087 = vmatprep.subr.mxu0 %v3276_v7 }
 0x40e   : > { %3099 = vmatpush3.msra.mxu1 %v1713_v48  ;;  %3088 = vmatpush3.msra.mxu0 %v1622_v53 }
 0x40f   : > { %3100 = vmatprep.subr.mxu1 %v3276_v7  ;;  %3089 = vmatprep.subr.mxu0 %v3276_v7 }
 0x410   : > { %3101 = vmatpush3.msra.mxu1 %v1712_v50  ;;  %3090 = vmatpush3.msra.mxu0 %v1621_v55 }
 0x411   : > { %3102 = vmatprep.subr.mxu1 %v3276_v7  ;;  %3091 = vmatprep.subr.mxu0 %v3276_v7 }
 0x412   : > { %3103 = vmatpush3.msra.mxu1 %v1711_v52  ;;  %3092 = vmatpush3.msra.mxu0 %v1620_v57  ;;  %v1809_v31 = vpop.permute.xlu1 %1808 }
 0x413   : > { %3104 = vmatprep.subr.mxu1 %v3276_v7  ;;  %3113 = vmatprep.subr.msk.mxu0 %vm1632_vm12, %v1942_v9 }
 0x414   : > { %3105 = vmatpush3.msra.mxu1 %v1710_v54  ;;  %v1613_v63 = vpop.permute.xlu0 %1612 }
 0x415   : > { %3106 = vmatprep.subr.mxu1 %v3276_v7  ;;  %v1618_v2 = vrot.slane %v1613_v63, %v3473_v10 }
 0x416   : > { %3107 = vmatpush3.msra.mxu1 %v1709_v56  ;;  %v1814_v33 = vpop.permute.xlu1 %1813 }
 0x417   : > { %3108 = vmatprep.subr.mxu1 %v3276_v7 }
 0x418   : > { %3109 = vmatpush3.msra.mxu1 %v1708_v58  ;;  %v1842_v32 = vpop.permute.xlu0 %1841 }
 0x419   : > { %3133 = vmatprep.subr.mxu1 %v3276_v7 }
 0x41a   : > { %v1884_v35 = vpop.permute.xlu1 %1883 }
 0x41c   : > { %v1847_v34 = vpop.permute.xlu0 %1846 }
 0x41e   : > { %v1819_v37 = vpop.permute.xlu1 %1818 }
 0x420   : > { %v1879_v36 = vpop.permute.xlu0 %1878 }
 0x422   : > { %v1824_v39 = vpop.permute.xlu1 %1823 }
 0x424   : > { %v1852_v38 = vpop.permute.xlu0 %1851 }
 0x426   : > { %v1889_v41 = vpop.permute.xlu1 %1888 }
 0x428   : > { %v1857_v40 = vpop.permute.xlu0 %1856 }
 0x42c   : > { %v1911_v42 = vpop.permute.xlu0 %1910 }
 0x450   : > { %v1457_v59 = vpop.f32.mrf.mxu1 }
 0x452   : > { %v3056_v60 = vpop.f32.mrf.mxu1 }
 0x4c3   : > { %v1530_v61 = vpop.f32.mrf.mxu0 }
 0x4c4   : > { %v1531_v0 = vadd.f32 %v1530_v61, %v1457_v59 }
 0x4c5   : > { %v3067_v62 = vpop.f32.mrf.mxu0 }
 0x4cb   : > { %v1605_v1 = vpop.f32.mrf.mxu1 }
 0x4cc   : > { %v1609_v4 = vadd.f32 %v1605_v1, %v1531_v0 }
 0x4cd   : > { %v3078_v5 = vpop.f32.mrf.mxu1 }
 0x4ce   : > { %v1619_v8 = vadd.f32 %v1618_v2, %v1609_v4 }
 0x4d0   : > { %3094 = vmatmul.mubr.msk.f32.vlgmr.msra.gmra.mxu0 %vm1628_vm13, %v1619_v8  ;;  %3111 = vmatmul.mubr.msk.f32.vlgmr.msra.gmra.mxu1 %vm1628_vm13, %v1619_v8 }
 0x4d1   : > { %3141 = vmatprep.mubr.msk.f32.mxu1 %vm3279_vm9, %v3276_v7  ;;  %3114 = vmatpush3.msk.msra.mxu0 %vm1632_vm12, %v1942_v9 }
 0x4d2   : > { %3115 = vmatprep.subr.mxu0 %v1941_v11 }
 0x4d3   : > { %3116 = vmatpush3.msra.mxu0 %v1941_v11 }
 0x4d4   : > { %3117 = vmatprep.subr.mxu0 %v1940_v12 }
 0x4d5   : > { %3118 = vmatpush3.msra.mxu0 %v1940_v12 }
 0x4d6   : > { %3119 = vmatprep.subr.mxu0 %v1939_v13 }
 0x4d7   : > { %3120 = vmatpush3.msra.mxu0 %v1939_v13 }
 0x4d8   : > { %3121 = vmatprep.subr.mxu0 %v1938_v16 }
 0x4d9   : > { %3122 = vmatpush3.msra.mxu0 %v1938_v16 }
 0x4da   : > { %3123 = vmatprep.subr.mxu0 %v1937_v25 }
 0x4db   : > { %3124 = vmatpush3.msra.mxu0 %v1937_v25 }
 0x4dc   : > { %3125 = vmatprep.subr.mxu0 %v1936_v28 }
 0x4dd   : > { %3126 = vmatpush3.msra.mxu0 %v1936_v28  ;;  %v2043_v28 = vld [vmem:[%s4150_s16] sm:$0xff] }
 0x4de   : > { %3155 = vmatprep.subr.mxu0 %v3276_v7 }
 0x590   : > { %v1702_v17 = vpop.f32.mrf.mxu0  ;;  %v1785_v18 = vpop.f32.mrf.mxu1 }
 0x591   : > { %v1703_v19 = vadd.f32 %v1702_v17, %v1627_v14  ;;  %v1786_v20 = vadd.f32 %v1785_v18, %v1715_v15 }
 0x592   : > { %v3095_v22 = vpop.f32.mrf.mxu0  ;;  %v3112_v23 = vpop.f32.mrf.mxu1 }
 0x593   : > { %v1706_v24 = vsel %vm1628_vm13, %v1703_v19, 0.0  ;;  %1798 = vrot.lane.b32.xlu0 %v1786_v20, %s4204_s24  ;;  %1794 = vrot.lane.b32.xlu1 %v1786_v20, %s4198_s29  ;;  %v1862_v43 = vrot.slane %v1786_v20, %v3473_v10 }
 0x594   : > { %1707 = vst [vmem:[%s3913_s1] sm:$0x1] %v1706_v24 }
 0x595   : > { %v1863_v50 = vmul.f32 %v1862_v43, %v1842_v32  ;;  %v1864_v55 = vmul.f32 %v1862_v43, %v1847_v34  ;;  %v1865_v62 = vmul.f32 %v1862_v43, %v1852_v38  ;;  %v1866_v1 = vmul.f32 %v1862_v43, %v1857_v40  ;;  %v2337_v34 = vld [vmem:[%s4153_s20 + $0xc8] sm:$0xf] }
 0x596   : > { %v2333_v40 = vld [vmem:[%s4153_s20 + $0xa8] sm:$0xff] }
 0x597   : > { %1915 = vperm.xlu0 %3211, %v1790_v26   ;;  %1893 = vperm.xlu1 %3212, %v2864_v27   ;;  %v2870_v27 = vld [vmem:[%s4149_s15 + $0x8] sm:$0xff] }
 0x59b   : > { %1925 = vperm.xlu0 %3211, %v1792_v29   ;;  %1920 = vperm.xlu1 %3212, %v1791_v30  }
 0x605   : > { %v1799_v44 = vpop.permute.xlu0 %1798  ;;  %v1795_v45 = vpop.permute.xlu1 %1794 }
 0x606   : > { %v1801_v46 = vsel %vm1379_vm11, %v1799_v44, 0.0  ;;  %v1797_v47 = vsel %vm708_vm0, 0.0, %v1795_v45  ;;  %v2330_v44 = vld [vmem:[%s4153_s20 + $0x90] sm:$0xff] }
 0x607   : > { %v1899_v48 = vrot.slane %v1801_v46, %v3473_v10  ;;  %v1829_v49 = vrot.slane %v1797_v47, %v3473_v10  ;;  %v2881_v45 = vld [vmem:[%s4149_s15 + $0x10] sm:$0xff]  ;;  %v2329_v46 = vld [vmem:[%s4153_s20 + $0x88] sm:$0xff] }
 0x609   : > { %v1830_v51 = vmul.f32 %v1829_v49, %v1809_v31  ;;  %v1831_v52 = vmul.f32 %v1829_v49, %v1814_v33  ;;  %v1900_v53 = vmul.f32 %v1899_v48, %v1879_v36  ;;  %v1832_v58 = vmul.f32 %v1829_v49, %v1819_v37  ;;  %v2080_v33 = vld [vmem:[%s4149_s15] sm:$0xff]  ;;  %v2335_v37 = vld [vmem:[%s4153_s20 + $0xb8] sm:$0xff] }
 0x60a   : > { %v1901_v59 = vmul.f32 %v1899_v48, %v1884_v35  ;;  %v1833_v61 = vmul.f32 %v1829_v49, %v1824_v39  ;;  %v1902_v12 = vmul.f32 %v1899_v48, %v1889_v41  ;;  %v2336_v36 = vld [vmem:[%s4153_s20 + $0xc0] sm:$0xf]  ;;  %v2334_v39 = vld [vmem:[%s4153_s20 + $0xb0] sm:$0xff]  ;;  %v2327_v49 = vld [vmem:[%s4153_s20 + $0x78] sm:$0xff] }
 0x60b   : > { %v1867_v54 = vadd.f32 %v1863_v50, %v1830_v51  ;;  %v1868_v56 = vadd.f32 %v1864_v55, %v1831_v52  ;;  %v1869_v2 = vadd.f32 %v1865_v62, %v1832_v58  ;;  %v2332_v41 = vld [vmem:[%s4153_s20 + $0xa0] sm:$0xff]  ;;  %v2326_v50 = vld [vmem:[%s4153_s20 + $0x70] sm:$0xff]  ;;  %v2325_v51 = vld [vmem:[%s4153_s20 + $0x68] sm:$0xff] }
 0x60c   : > { %v1870_v11 = vadd.f32 %v1866_v1, %v1833_v61  ;;  %v2324_v52 = vld [vmem:[%s4153_s20 + $0x60] sm:$0xff]  ;;  %v2321_v55 = vld [vmem:[%s4153_s20 + $0x48] sm:$0xff]  ;;  %v2318_v58 = vld [vmem:[%s4153_s20 + $0x30] sm:$0xff] }
 0x60d   : > { %v1904_v57 = vadd.f32 %v1900_v53, %v1867_v54  ;;  %v1905_v63 = vadd.f32 %v1901_v59, %v1868_v56  ;;  %v1906_v15 = vadd.f32 %v1902_v12, %v1869_v2  ;;  %v2323_v53 = vld [vmem:[%s4153_s20 + $0x58] sm:$0xff]  ;;  %v2322_v54 = vld [vmem:[%s4153_s20 + $0x50] sm:$0xff]  ;;  %v2320_v56 = vld [vmem:[%s4153_s20 + $0x40] sm:$0xff] }
 0x60e   : > { %v2317_v59 = vld [vmem:[%s4153_s20 + $0x28] sm:$0xff]  ;;  %v2315_v61 = vld [vmem:[%s4153_s20 + $0x18] sm:$0xff]  ;;  %v2314_v62 = vld [vmem:[%s4153_s20 + $0x10] sm:$0xff] }
 0x60f   : > { %v1928_v60 = vadd.f32 %v1911_v42, %v1904_v57  ;;  %v2331_v42 = vld [vmem:[%s4153_s20 + $0x98] sm:$0xff]  ;;  %v2312_v1 = vld [vmem:[%s4153_s20] sm:$0xff] }
 0x610   : > { %v2319_v57 = vld [vmem:[%s4153_s20 + $0x38] sm:$0xff] }
 0x611   : > { %v1932_v0 = vmax.f32 %v1928_v60, 0.0  ;;  %v2316_v60 = vld [vmem:[%s4153_s20 + $0x20] sm:$0xff] }
 0x612   : > { %v1916_v4 = vpop.permute.xlu0 %1915  ;;  %v1894_v5 = vpop.permute.xlu1 %1893 }
 0x613   : > { %v1929_v8 = vadd.f32 %v1916_v4, %v1905_v63  ;;  %v1903_v9 = vmul.f32 %v1899_v48, %v1894_v5  ;;  %3127 = vmatprep.mubr.msk.f32.mxu0 %vm1628_vm13, %v1932_v0  ;;  %v2328_v48 = vld [vmem:[%s4153_s20 + $0x80] sm:$0xff]  ;;  %v2313_v0 = vld [vmem:[%s4153_s20 + $0x8] sm:$0xff] }
 0x615   : > { %v1933_v13 = vmax.f32 %v1929_v8, 0.0  ;;  %v1907_v14 = vadd.f32 %v1903_v9, %v1870_v11 }
 0x616   : > { %v1926_v16 = vpop.permute.xlu0 %1925  ;;  %v1921_v17 = vpop.permute.xlu1 %1920 }
 0x617   : > { %v1931_v18 = vadd.f32 %v1926_v16, %v1907_v14  ;;  %v1930_v19 = vadd.f32 %v1921_v17, %v1906_v15  ;;  %3128 = vmatmul.mubr.msk.f32.vlgmr.msra.gmra.mxu0 %vm1628_vm13, %v1933_v13 }
 0x619   : > { %v1935_v20 = vmax.f32 %v1931_v18, 0.0  ;;  %v1934_v22 = vmax.f32 %v1930_v19, 0.0  ;;  %v2890_v18 = vld [vmem:[%s4151_s17 + $0x1] sm:$0x1] }
 0x61a   : > { %v2418_v19 = vld [vmem:[#allocation3] sm:$0x1] }
 0x61b   : > { %3130 = vmatprep.mubr.msk.f32.mxu0 %vm1628_vm13, %v1934_v22 }
 0x61c   : > { %3131 = vmatmul.mubr.msk.f32.gmra.mxu0 %vm1628_vm13, %v1935_v20 }
 0x61d   : > { %3163 = vmatprep.mubr.msk.f32.mxu0 %vm3279_vm9, %v3276_v7 }
 0x6d7   : > { %v3129_v23 = vpop.f32.mrf.mxu0 }
 0x6d8   : > { %2050 = vrot.lane.b32.xlu0 %v3129_v23, %s4198_s29 }
 0x6d9   : > { %v2024_v24 = vpop.f32.mrf.mxu0 }
 0x6dc   : > { %v3132_v25 = vpop.f32.mrf.mxu0 }
 0x6dd   : > { %2054 = vrot.lane.b32.xlu1 %v3132_v25, %s4198_s29  ;;  %3134 = vmatpush3.msra.mxu1 %v3132_v25 }
 0x6de   : > { %v2034_v26 = vpop.f32.mrf.mxu0  ;;  %3135 = vmatprep.subr.mxu1 %v3276_v7 }
 0x6df   : > { %2052 = vrot.lane.b32.xlu0 %v2034_v26, %s4198_s29  ;;  %3136 = vmatpush3.msra.mxu1 %v2034_v26 }
 0x6e0   : > { %3137 = vmatprep.subr.mxu1 %v3276_v7 }
 0x6e1   : > { %2070 = vrot.lane.b32.xlu1 %v3132_v25, %s4204_s24  ;;  %3138 = vmatpush3.msra.mxu1 %v3129_v23 }
 0x6e2   : > { %3139 = vmatprep.subr.mxu1 %v3276_v7 }
 0x6e3   : > { %2048 = vrot.lane.b32.xlu0 %v2024_v24, %s4198_s29  ;;  %3140 = vmatpush3.msra.mxu1 %v2024_v24 }
 0x6e4   : > { %3144 = vmatprep.subr.mxu1 %v3276_v7  ;;  %3142 = vmatmul.mubr.msk.f32.vlgmr.msra.gmra.mxu1 %vm1387_vm10, %v2870_v27 }
 0x6e5   : > { %2068 = vrot.lane.b32.xlu1 %v2034_v26, %s4204_s24  ;;  %3152 = vmatprep.mubr.msk.f32.mxu1 %vm3279_vm9, %v3276_v7 }
 0x6e7   : > { %2064 = vrot.lane.b32.xlu0 %v2024_v24, %s4204_s24  ;;  %v2437_v24 = vld [vmem:[%s4151_s17] sm:$0x1] }
 0x6e9   : > { %2066 = vrot.lane.b32.xlu1 %v3129_v23, %s4204_s24 }
 0x6ed   : > { %2307 = vperm.xlu1 %3212, %v2043_v28   ;;  %v2895_v28 = vld [vmem:[%s4151_s17 + $0x2] sm:$0x1] }
 0x74a   : > { %v2051_v29 = vpop.permute.xlu0 %2050 }
 0x74f   : > { %v2055_v30 = vpop.permute.xlu1 %2054 }
 0x750   : > { %3145 = vmatpush3.msk.msra.mxu1 %vm3639_vm5, %v2055_v30 }
 0x751   : > { %v2053_v31 = vpop.permute.xlu0 %2052  ;;  %3146 = vmatprep.subr.mxu1 %v3276_v7 }
 0x752   : > { %3147 = vmatpush3.msk.msra.mxu1 %vm3639_vm5, %v2053_v31 }
 0x753   : > { %v2071_v32 = vpop.permute.xlu1 %2070  ;;  %3148 = vmatprep.subr.mxu1 %v3276_v7 }
 0x754   : > { %3149 = vmatpush3.msk.msra.mxu1 %vm3639_vm5, %v2051_v29  ;;  %3156 = vmatpush3.msk.msra.mxu0 %vm891_vm6, %v2071_v32 }
 0x755   : > { %v2049_v35 = vpop.permute.xlu0 %2048  ;;  %3150 = vmatprep.subr.mxu1 %v3276_v7  ;;  %3157 = vmatprep.subr.mxu0 %v3276_v7 }
 0x756   : > { %3151 = vmatpush3.msk.msra.mxu1 %vm3639_vm5, %v2049_v35 }
 0x757   : > { %v2069_v38 = vpop.permute.xlu1 %2068  ;;  %3153 = vmatmul.mubr.msk.f32.vlgmr.msra.gmra.mxu1 %vm1387_vm10, %v2080_v33  ;;  %2887 = vmatprep.subr.msk.mxu1 %vm1257_vm7, %v2337_v34 }
 0x758   : > { %3158 = vmatpush3.msk.msra.mxu0 %vm891_vm6, %v2069_v38  ;;  %2888 = vmatpush1.msk.msra.mxu1 %vm1257_vm7, %v2336_v36 }
 0x759   : > { %3159 = vmatprep.subr.mxu0 %v3276_v7  ;;  %2355 = vmatprep.subr.mxu1 %v2335_v37  ;;  %v2065_v47 = vpop.permute.xlu0 %2064 }
 0x75a   : > { %2356 = vmatpush1.msra.mxu1 %v2334_v39  ;;  %2411 = vmatprep.mubr.f32.mxu1 %v3276_v7 }
 0x75b   : > { %v2067_v43 = vpop.permute.xlu1 %2066  ;;  %2357 = vmatprep.subr.mxu1 %v2333_v40 }
 0x75c   : > { %3160 = vmatpush3.msk.msra.mxu0 %vm891_vm6, %v2067_v43  ;;  %2358 = vmatpush1.msra.mxu1 %v2332_v41 }
 0x75d   : > { %3161 = vmatprep.subr.mxu0 %v3276_v7  ;;  %2359 = vmatprep.subr.mxu1 %v2331_v42 }
 0x75e   : > { %3162 = vmatpush3.msk.msra.mxu0 %vm891_vm6, %v2065_v47  ;;  %2360 = vmatpush1.msra.mxu1 %v2330_v44 }
 0x75f   : > { %3164 = vmatmul.mubr.msk.f32.vlgmr.msra.gmra.mxu0 %vm1387_vm10, %v2881_v45  ;;  %2361 = vmatprep.subr.mxu1 %v2329_v46 }
 0x760   : > { %2362 = vmatpush1.msra.mxu1 %v2328_v48  ;;  %2507 = vmatprep.mubr.f32.mxu0 %v3276_v7 }
 0x761   : > { %2363 = vmatprep.subr.mxu1 %v2327_v49 }
 0x762   : > { %2364 = vmatpush1.msra.mxu1 %v2326_v50 }
 0x763   : > { %2365 = vmatprep.subr.mxu1 %v2325_v51 }
 0x764   : > { %2366 = vmatpush1.msra.mxu1 %v2324_v52 }
 0x765   : > { %2367 = vmatprep.subr.mxu1 %v2323_v53 }
 0x766   : > { %2368 = vmatpush1.msra.mxu1 %v2322_v54 }
 0x767   : > { %2369 = vmatprep.subr.mxu1 %v2321_v55 }
 0x768   : > { %2370 = vmatpush1.msra.mxu1 %v2320_v56  ;;  %v2308_v12 = vpop.permute.xlu1 %2307 }
 0x769   : > { %2371 = vmatprep.subr.mxu1 %v2319_v57 }
 0x76a   : > { %2372 = vmatpush1.msra.mxu1 %v2318_v58 }
 0x76b   : > { %2373 = vmatprep.subr.mxu1 %v2317_v59 }
 0x76c   : > { %2374 = vmatpush1.msra.mxu1 %v2316_v60 }
 0x76d   : > { %2375 = vmatprep.subr.mxu1 %v2315_v61 }
 0x76e   : > { %2376 = vmatpush1.msra.mxu1 %v2314_v62 }
 0x76f   : > { %2377 = vmatprep.subr.mxu1 %v2313_v0 }
 0x770   : > { %2378 = vmatpush1.msra.mxu1 %v2312_v1 }
 0x7a4   : > { %v2152_v63 = vpop.f32.mrf.mxu1 }
 0x7a6   : > { %v3143_v2 = vpop.f32.mrf.mxu1 }
 0x817   : > { %v2225_v4 = vpop.f32.mrf.mxu1 }
 0x818   : > { %v2226_v8 = vadd.f32 %v2225_v4, %v2152_v63 }
 0x819   : > { %v3154_v5 = vpop.f32.mrf.mxu1 }
 0x81f   : > { %v2300_v9 = vpop.f32.mrf.mxu0 }
 0x820   : > { %v2304_v11 = vadd.f32 %v2300_v9, %v2226_v8 }
 0x821   : > { %v3165_v13 = vpop.f32.mrf.mxu0 }
 0x822   : > { %v2310_v14 = vadd.f32 %v2308_v12, %v2304_v11 }
 0x824   : > { %v2311_v15 = vmax.f32 %v2310_v14, 0.0 }
 0x826   : > { %2889 = vmatmul.mubr.msk.f32.vlgmr.msra.gmra.mxu1 %vm1244_vm8, %v2311_v15 }
 0x8e6   : > { %v2413_v16 = vpop.f32.mrf.mxu1 }
 0x8e7   : > { %2421 = vrot.lane.b32.xlu0 %v2413_v16, %s4198_s29 }
 0x8e8   : > { %v2415_v17 = vpop.f32.mrf.mxu1 }
 0x8e9   : > { %2423 = vrot.lane.b32.xlu1 %v2415_v17, %s4198_s29  ;;  %2473 = vmatprep.subr.mxu0 %v2415_v17  ;;  %s3217_s29 = sshll.u32 %s3280_s4, 4  ;;  %s3218_s29 = int_to_ptr.vmem [resolvable:$false] %s3217_s29 }
 0x8ea   : > { %2474 = vmatpush1.msra.mxu0 %v2413_v16  ;;  %p3220_p0 = scmp.lt.s32.totalorder %s2721_s7, %s3218_s29 }
 0x8eb   : > { %2429 = vrot.lane.b32.xlu0 %v2413_v16, %s4204_s24  ;;  %2891 = vmatmul.mubr.msk.f32.vlgmr.msra.gmra.mxu0 %vm902_vm4, %v2890_v18 }
 0x8ec   : > { %2581 = vmatprep.mubr.f32.mxu0 %v3276_v7 }
 0x8ed   : > { %2431 = vrot.lane.b32.xlu1 %v2415_v17, %s4204_s24  ;;  %s3219_s24 = scalar_lea.vmem %s3218_s29, 32 }
 0x8ee   : > { %p3221_p1 = scmp.lt.s32.totalorder %s3219_s24, %s3213_s0 }
 0x8ef   : > { %2668 = vperm.xlu0 %3211, %v2418_v19  }
 0x8f0   : > { %p3222_p2 = por %p3221_p1, %p3220_p0 }
 0x8f2   : > { %p3223_p3 = pnand %p3222_p2, %p3216_p13 }
 0x959   : > { %v2422_v20 = vpop.permute.xlu0 %2421 }
 0x95b   : > { %v2424_v22 = vpop.permute.xlu1 %2423 }
 0x95c   : > { %v2425_v23 = vsel %vm708_vm0, %v2422_v20, %v2424_v22 }
 0x95d   : > { %2547 = vmatprep.subr.mxu0 %v2425_v23  ;;  %v2430_v25 = vpop.permute.xlu0 %2429 }
 0x95e   : > { %2893 = vmatpush1.msk.msra.mxu0 %vm3639_vm5, %v2422_v20 }
 0x95f   : > { %v2432_v26 = vpop.permute.xlu1 %2431  ;;  %2894 = vmatmul.mubr.msk.f32.vlgmr.msra.gmra.mxu0 %vm902_vm4, %v2437_v24 }
 0x960   : > { %v2433_v27 = vsel %vm717_vm2, %v2430_v25, %v2432_v26  ;;  %2896 = vmatprep.subr.msk.mxu0 %vm721_vm1, %v2432_v26  ;;  %2657 = vmatprep.mubr.f32.mxu0 %v3276_v7 }
 0x961   : > { %2624 = vmatpush1.msra.mxu0 %v2433_v27 }
 0x963   : > { %2897 = vmatmul.mubr.msk.f32.vlgmr.msra.gmra.mxu0 %vm902_vm4, %v2895_v28 }
 0x964   : > { %3226 = shalt.err (!%p3223_p3)
}
 0x965   : > { %s3227_s18 = scalar_lea.hbm %s2718_s6, 16  ;;  %s3231_s2 = scalar_lea.hbm %s4155_s22, 32 }
 0x966   : > { %p3228_p4 = scmp.ne.s32.totalorder %s2718_s6, %s3227_s18  ;;  %p3232_p9 = scmp.lt.s32.totalorder %s2718_s6, %s4155_s22 }
 0x967   : > { %p3233_p10 = scmp.lt.s32.totalorder %s3231_s2, %s3227_s18 }
 0x968   : > { %p3229_p7 = pnand %p3228_p4, %p3441_p5 }
 0x969   : > { %p3234_p11 = por %p3233_p10, %p3232_p9 }
 0x96a   : > { %p3230_p8 = pneg %p3229_p7 }
 0x96c   : > { %p3235_p12 = pnand %p3234_p11, %p3230_p8 }
 0x96e   : > { %3238 = shalt.err (!%p3235_p12)
}
 0x96f   : > { %3166 = dma.vmem_to_hbm [thread:$0]  (%p3441_p5), %s2721_s7, 16, %s2718_s6, %s2705_s28   ;;  %v3281_v30 = vmov 1966171168   ;;  %v2669_v34 = vpop.permute.xlu0 %2668  ;;  %vm2697_vm14 = vcmp.lt.s32.totalorder %v696_v3, 200 }
 0x970   : > { %v2681_v31 = vunpack.c.l.s4 %v3281_v30  ;;  %v2674_v40 = vrot.slane %v2669_v34, %v3473_v10  ;;  %s4206_s27 = sshll.u32 %s3459_s25, 1 }
 0x971   : > { %s692_s30 = scalar_lea.vmem %s4154_s21, %s4206_s27 }
 0x972   : > { %v2682_v38 = vunpack.c.0.s8 %v2681_v31 }
 0x974   : > { %v2685_v44 = vsub.s32 %v2682_v38, %v3462_v6 }
 0x9ab   : > { %v2509_v7 = vpop.f32.mrf.mxu0 }
 0x9ad   : > { %v2511_v21 = vpop.f32.mrf.mxu0 }
 0xa1f   : > { %v2583_v29 = vpop.f32.mrf.mxu0 }
 0xa20   : > { %v2584_v33 = vadd.f32 %v2583_v29, %v2509_v7 }
 0xa21   : > { %v2585_v32 = vpop.f32.mrf.mxu0 }
 0xa22   : > { %v2586_v36 = vadd.f32 %v2585_v32, %v2511_v21 }
 0xa23   : > { %v2659_v35 = vpop.f32.mrf.mxu0 }
 0xa24   : > { %v2664_v37 = vadd.f32 %v2659_v35, %v2584_v33 }
 0xa25   : > { %v2661_v39 = vpop.f32.mrf.mxu0 }
 0xa26   : > { %v2665_v41 = vadd.f32 %v2661_v39, %v2586_v36  ;;  %v2675_v42 = vadd.f32 %v2674_v40, %v2664_v37 }
 0xa28   : > { %v2676_v43 = vadd.f32 %v2674_v40, %v2665_v41 }
 0xa2a   : > { %v2679_v45 = vcombine.low %v2675_v42, %v2676_v43 }
 0xa2c   : > { %v2686_v46 = vrot.slane %v2679_v45, %v2685_v44 }
 0xa2e   : > { %v2693_v47 = vrot.slane %v2686_v46, %v2685_v44 }
 0xa30   : > { %2699 = vst.msk [vmem:[%s692_s30] sm:$0x3] %vm2697_vm14, %v2693_v47 }
 0xa31 PF: > { %s4207_s28 = sld [smem:[#allocation7_spill]]  ;;  %p3172_p5 = scmp.ge.s32.totalorder %s3273_s5, 2 }
 0xa33   : > { %p3169_p13 = pnand %p3172_p5, %p3445_p6 }
 0xa35   : > { %p3170_p0 = pneg %p3169_p13 }
 0xa37   : > { %s2739_s4 = sand.u32 1, %s4207_s28  }
 0xa38   : > { %s2740_s29 = scalar_lea.sflag [#allocation5], %s2739_s4 }
 0xa39   : > { %3256 = dma.done.wait (%p3170_p0), %s2740_s29, 16  }
 0xa3a   : > { %3258 = vsyncadd (%p3170_p0), %s2740_s29, 4294967280  ;;  %s4209_s5 = sld [smem:[#allocation9_spill]]  ;;  %s4212_s0 = smov %s3265_s23 }
 0xa3b   : > { %s4210_s25 = sld [smem:[#allocation8_spill]] }
 0xa3c   : > { %s4211_s1 = sld [smem:[#allocation10_spill]] }
 0xa40   : > { %p37_p1 = scmp.ge.s32.totalorder %s4209_s5, 4  }
 0xa41   : > { %s4213_s23 = smov %s4210_s25 }
 0xa42   :  { %39 = sbr.rel (!%p37_p1) target bundleno = 21 (0x15), region = 163 }
 0xa47   :  { %2744 = vsyncpa [#allocation5], 1 }
 0xa48   :  { %2746 = vsyncpa [#allocation5 + $0x1], 1 }

</bundles_post_ra>
